<compile_context>
chip_gen: v7x
topology: tpu7x:2x2x1
jax: 0.10.0
libtpu: 0.0.40
codegen_flags: <defaults>
</compile_context>

<pallas_src>
import functools

import jax
import jax.numpy as jnp
from jax.experimental import pallas as pl
from jax.experimental.pallas import tpu as pltpu


def _upsample_conv_kernel(x_ref, w_ref, b_ref, o_ref, xp_ref, *, H, W):
    """One batch-block.

    x_ref : (nb, H, W, C_in)        channels-last activations (bf16 or f32)
    w_ref : (4, 4*C_in, C_out)      folded weights; phase = 2p+q, K = (2r+s)*C_in + i
    b_ref : (1, C_out)              bias (f32)
    o_ref : (nb, H, 2, W, 2*C_out)  output; element [n, a, p, b, q*C_out + c]
    xp_ref: (nb, H+2, W+2, C_in)    VMEM scratch holding the zero-haloed input
    """
    nb = x_ref.shape[0]
    C_in = x_ref.shape[-1]
    C_out = w_ref.shape[-1]

    # Build the 1-pixel zero halo in VMEM (replaces a wrapper jnp.pad HBM pass).
    xp_ref[...] = jnp.zeros(xp_ref.shape, xp_ref.dtype)
    xp_ref[:, 1:H + 1, 1:W + 1, :] = x_ref[...]

    bias = b_ref[...]  # (1, C_out) f32

    for p in range(2):              # static -> fully unrolled at trace time
        for q in range(2):
            # K-concatenate the 4 taps of this phase along channels (lanes):
            # one MXU matmul with K = 4*C_in instead of 4 small ones + adds.
            taps = [xp_ref[:, p + r:p + r + H, q + s:q + s + W, :]
                    for r in range(2) for s in range(2)]
            lhs = jnp.concatenate(taps, axis=-1).reshape(nb * H * W, 4 * C_in)
            res = jnp.dot(lhs, w_ref[2 * p + q],
                          preferred_element_type=jnp.float32) + bias
            res = res.reshape(nb, H, W, C_out).astype(o_ref.dtype)
            # Row phase p is an explicit (untiled) output dim; column phase q
            # is packed on lanes at a 128-aligned offset -> full-lane stores.
            o_ref[:, :, p, :, q * C_out:(q + 1) * C_out] = res


def _fold_upsample_into_conv(weight):
    """Torch-layout (C_out, C_in, 3, 3) conv weight -> (4, 4*C_in, C_out).

    A[p, r, ky] says which rows ky of the 3x3 kernel land on x-row a + (p+r-1)
    for output row 2a+p under nearest x2 upsampling (same matrix for columns).
    Output layout: phase index = 2p+q, contraction index = (2r+s)*C_in + i
    (must match the kernel's tap-concatenation order).
    """
    A = jnp.array([[[1., 0., 0.], [0., 1., 1.]],
                   [[1., 1., 0.], [0., 0., 1.]]], dtype=jnp.float32)
    c_out, c_in = weight.shape[0], weight.shape[1]
    weff = jnp.einsum('prk,qsl,oikl->pqrsio', A, A, weight.astype(jnp.float32))
    return weff.reshape(4, 4 * c_in, c_out)


def upsample_resize_conv(x_nchw, weight, bias, *, use_bf16_matmul=True,
                         batch_block=None, channels_last_out=False):
    """Nearest x2 upsample followed by Conv2d(C, C, 3, padding=1).

    x_nchw: (N, C, H, W) f32;  weight: (C, C, 3, 3);  bias: (C,)
    returns: (N, C, 2H, 2W) f32 (or (N, 2H, 2W, C) if channels_last_out).
    """
    N, C, H, W = x_nchw.shape
    assert weight.shape == (C, C, 3, 3) and bias.shape == (C,)
    # Lane/sublane density assumptions of this kernel (demo satisfies both).
    assert C % 128 == 0, "C must be a multiple of 128 (lane-dense matmul/store)"
    assert W % 8 == 0, "W must be a multiple of 8 (sublane-dense reshapes)"

    if batch_block is None:
        batch_block = N            # demo scale: one grid step, M = N*H*W
    assert N % batch_block == 0
    nb = batch_block

    compute_dtype = jnp.bfloat16 if use_bf16_matmul else jnp.float32

    # NCHW -> channels-last; cast ONCE (bf16 halves input DMA bytes).  In a
    # channels-last pipeline this transpose disappears at the graph edge.
    x_in = jnp.transpose(x_nchw, (0, 2, 3, 1)).astype(compute_dtype)

    w_folded = _fold_upsample_into_conv(weight).astype(compute_dtype)  # (4,4C,C)
    b2d = bias.reshape(1, C).astype(jnp.float32)

    kernel = functools.partial(_upsample_conv_kernel, H=H, W=W)

    flops = 2 * N * H * W * (4 * C) * C * 4            # 4 phases, K = 4C matmuls
    bytes_accessed = (N * H * W * C * x_in.dtype.itemsize
                      + 4 * 4 * C * C * w_folded.dtype.itemsize
                      + C * 4
                      + N * H * 2 * W * 2 * C * 4)

    out_blocks = pl.pallas_call(
        kernel,
        out_shape=jax.ShapeDtypeStruct((N, H, 2, W, 2 * C), jnp.float32),
        grid=(N // nb,),
        in_specs=[
            pl.BlockSpec((nb, H, W, C), lambda n: (n, 0, 0, 0)),   # x (unpadded)
            pl.BlockSpec((4, 4 * C, C), lambda n: (0, 0, 0)),      # folded weights
            pl.BlockSpec((1, C), lambda n: (0, 0)),                # bias
        ],
        out_specs=pl.BlockSpec((nb, H, 2, W, 2 * C),
                               lambda n: (n, 0, 0, 0, 0)),
        scratch_shapes=[pltpu.VMEM((nb, H + 2, W + 2, C), compute_dtype)],
        compiler_params=pltpu.CompilerParams(
            dimension_semantics=("parallel",)),
        cost_estimate=pl.CostEstimate(flops=flops, transcendentals=0,
                                      bytes_accessed=bytes_accessed),
    )(x_in, w_folded, b2d)

    # [n, a, p, b, q*C + c] -> (N, 2H, 2W, C) is a pure, FREE reshape: no
    # strided transpose pass over the output in HBM.
    out_nhwc = out_blocks.reshape(N, 2 * H, 2 * W, C)
    if channels_last_out:
        return out_nhwc
    # Single graph-edge transpose to the module's NCHW contract.
    return jnp.transpose(out_nhwc, (0, 3, 1, 2))


def reference_jax(x_nchw, weight, bias):
    """Pure-JAX reference mirroring the PyTorch module exactly (f32)."""
    up = jnp.repeat(jnp.repeat(x_nchw.astype(jnp.float32), 2, axis=2), 2, axis=3)
    out = jax.lax.conv_general_dilated(
        up, weight.astype(jnp.float32),
        window_strides=(1, 1), padding=((1, 1), (1, 1)),
        dimension_numbers=("NCHW", "OIHW", "NCHW"),
        precision=jax.lax.Precision.HIGHEST)
    return out + bias.reshape(1, -1, 1, 1)


if __name__ == "__main__":
    # Small but lane/sublane-dense shapes: C multiple of 128, W multiple of 8,
    # so every MXU operand, load and store is unmasked and full-lane.
    N, C, H, W = 2, 128, 8, 8

    key = jax.random.PRNGKey(0)
    k_x, k_w, k_b = jax.random.split(key, 3)
    x = jax.random.normal(k_x, (N, C, H, W), dtype=jnp.float32)
    weight = 0.05 * jax.random.normal(k_w, (C, C, 3, 3), dtype=jnp.float32)
    bias = 0.05 * jax.random.normal(k_b, (C,), dtype=jnp.float32)

    ref = jax.block_until_ready(reference_jax(x, weight, bias))

    # Exact-f32 operand path first: tighter tolerance that catches folding /
    # halo / indexing regressions which the bf16 tolerance could mask.
    out_f32 = jax.block_until_ready(
        upsample_resize_conv(x, weight, bias, use_bf16_matmul=False))
    assert out_f32.shape == (N, C, 2 * H, 2 * W), out_f32.shape
    assert jnp.allclose(out_f32, ref, atol=2e-2, rtol=2e-2), (
        "f32 path mismatch vs reference; max abs err = "
        f"{float(jnp.max(jnp.abs(out_f32 - ref)))}")

    # Fast path: bf16 MXU operands, f32 accumulation (~0.3% relative error).
    out = jax.block_until_ready(
        upsample_resize_conv(x, weight, bias, use_bf16_matmul=True))
    assert out.shape == (N, C, 2 * H, 2 * W), out.shape
    assert jnp.allclose(out, ref, atol=5e-2, rtol=5e-2), (
        "bf16 path mismatch vs reference; max abs err = "
        f"{float(jnp.max(jnp.abs(out - ref)))}")

    print("KERNEL_OK")
</pallas_src>

<mosaic_0001>
module attributes {stable_mosaic.version = 11 : i64} {
  func.func @_upsample_conv_kernel(%arg0: i32, %arg1: memref<2x8x8x128xf32, #tpu.memory_space<vmem>>, %arg2: memref<4x512x128xf32, #tpu.memory_space<vmem>>, %arg3: memref<1x128xf32, #tpu.memory_space<vmem>>, %arg4: memref<2x8x2x8x256xf32, #tpu.memory_space<vmem>>, %arg5: memref<2x10x10x128xf32, #tpu.memory_space<vmem>>) attributes {dimension_semantics = [#tpu.dimension_semantics<parallel>], iteration_bounds = array<i64: 1>, scalar_prefetch = 0 : i64, scratch_operands = 1 : i64, tpu.core_type = #tpu.core_type<tc>, window_params = [{transform_indices = @transform_0, window_bounds = array<i64: 2, 8, 8, 128>}, {pipeline_mode = #tpu.pipeline_mode<synchronous>, transform_indices = @transform_1, window_bounds = array<i64: 4, 512, 128>}, {pipeline_mode = #tpu.pipeline_mode<synchronous>, transform_indices = @transform_2, window_bounds = array<i64: 1, 128>}, {transform_indices = @transform_3, window_bounds = array<i64: 2, 8, 2, 8, 256>}]} {
    %cst = arith.constant 0.000000e+00 : f32
    %0 = vector.broadcast %cst : f32 to vector<2x10x10x128xf32>
    %c0 = arith.constant 0 : index
    %c0_0 = arith.constant 0 : index
    %c0_1 = arith.constant 0 : index
    %c0_2 = arith.constant 0 : index
    %1 = vector.load %arg5[%c0, %c0_0, %c0_1, %c0_2] : memref<2x10x10x128xf32, #tpu.memory_space<vmem>>, vector<2x10x10x128xf32>
    tpu.vector_store %arg5[%c0, %c0_0, %c0_1, %c0_2], %0 {strides = array<i32>} : memref<2x10x10x128xf32, #tpu.memory_space<vmem>>, vector<2x10x10x128xf32>,
    %c0_3 = arith.constant 0 : index
    %c0_4 = arith.constant 0 : index
    %c0_5 = arith.constant 0 : index
    %c0_6 = arith.constant 0 : index
    %2 = vector.load %arg1[%c0_3, %c0_4, %c0_5, %c0_6] : memref<2x8x8x128xf32, #tpu.memory_space<vmem>>, vector<2x8x8x128xf32>
    %c0_7 = arith.constant 0 : index
    %c1 = arith.constant 1 : index
    %c1_8 = arith.constant 1 : index
    %c0_9 = arith.constant 0 : index
    %3 = vector.load %arg5[%c0_7, %c1, %c1_8, %c0_9] : memref<2x10x10x128xf32, #tpu.memory_space<vmem>>, vector<2x8x8x128xf32>
    tpu.vector_store %arg5[%c0_7, %c1, %c1_8, %c0_9], %2 {strides = array<i32>} : memref<2x10x10x128xf32, #tpu.memory_space<vmem>>, vector<2x8x8x128xf32>,
    %c0_10 = arith.constant 0 : index
    %c0_11 = arith.constant 0 : index
    %4 = vector.load %arg3[%c0_10, %c0_11] : memref<1x128xf32, #tpu.memory_space<vmem>>, vector<1x128xf32>
    %c0_12 = arith.constant 0 : index
    %c0_13 = arith.constant 0 : index
    %c0_14 = arith.constant 0 : index
    %c0_15 = arith.constant 0 : index
    %5 = vector.load %arg5[%c0_12, %c0_13, %c0_14, %c0_15] : memref<2x10x10x128xf32, #tpu.memory_space<vmem>>, vector<2x8x8x128xf32>
    %c0_16 = arith.constant 0 : index
    %c0_17 = arith.constant 0 : index
    %c1_18 = arith.constant 1 : index
    %c0_19 = arith.constant 0 : index
    %6 = vector.load %arg5[%c0_16, %c0_17, %c1_18, %c0_19] : memref<2x10x10x128xf32, #tpu.memory_space<vmem>>, vector<2x8x8x128xf32>
    %c0_20 = arith.constant 0 : index
    %c1_21 = arith.constant 1 : index
    %c0_22 = arith.constant 0 : index
    %c0_23 = arith.constant 0 : index
    %7 = vector.load %arg5[%c0_20, %c1_21, %c0_22, %c0_23] : memref<2x10x10x128xf32, #tpu.memory_space<vmem>>, vector<2x8x8x128xf32>
    %c0_24 = arith.constant 0 : index
    %c1_25 = arith.constant 1 : index
    %c1_26 = arith.constant 1 : index
    %c0_27 = arith.constant 0 : index
    %8 = vector.load %arg5[%c0_24, %c1_25, %c1_26, %c0_27] : memref<2x10x10x128xf32, #tpu.memory_space<vmem>>, vector<2x8x8x128xf32>
    %9 = tpu.concatenate %5, %6, %7, %8 in 3 : vector<2x8x8x128xf32>, vector<2x8x8x128xf32>, vector<2x8x8x128xf32>, vector<2x8x8x128xf32> -> vector<2x8x8x512xf32>
    %10 = vector.shape_cast %9 : vector<2x8x8x512xf32> to vector<128x512xf32>
    %c0_28 = arith.constant 0 : index
    %c0_29 = arith.constant 0 : index
    %c0_30 = arith.constant 0 : index
    %11 = vector.load %arg2[%c0_28, %c0_29, %c0_30] : memref<4x512x128xf32, #tpu.memory_space<vmem>>, vector<1x512x128xf32>
    %12 = vector.shape_cast %11 : vector<1x512x128xf32> to vector<512x128xf32>
    %cst_31 = arith.constant dense<0.000000e+00> : vector<128x128xf32>
    %13 = tpu.matmul %10, %12, %cst_31 {dimension_numbers = #tpu.dot_dimension_numbers<[1], [0], [0], [1], [0, 0, 1, 1], [], []>} : vector<128x512xf32>, vector<512x128xf32>, vector<128x128xf32> -> vector<128x128xf32>
    %14 = vector.broadcast %4 : vector<1x128xf32> to vector<128x128xf32>
    %15 = arith.addf %13, %14 : vector<128x128xf32>
    %16 = vector.shape_cast %15 : vector<128x128xf32> to vector<2x8x8x128xf32>
    %c0_32 = arith.constant 0 : index
    %c0_33 = arith.constant 0 : index
    %c0_34 = arith.constant 0 : index
    %c0_35 = arith.constant 0 : index
    %c0_36 = arith.constant 0 : index
    %17 = vector.load %arg4[%c0_32, %c0_33, %c0_34, %c0_35, %c0_36] : memref<2x8x2x8x256xf32, #tpu.memory_space<vmem>>, vector<2x8x1x8x128xf32>
    %18 = vector.shape_cast %17 : vector<2x8x1x8x128xf32> to vector<2x8x8x128xf32>
    %19 = vector.shape_cast %16 : vector<2x8x8x128xf32> to vector<2x8x1x8x128xf32>
    tpu.vector_store %arg4[%c0_32, %c0_33, %c0_34, %c0_35, %c0_36], %19 {strides = array<i32>} : memref<2x8x2x8x256xf32, #tpu.memory_space<vmem>>, vector<2x8x1x8x128xf32>,
    %c0_37 = arith.constant 0 : index
    %c0_38 = arith.constant 0 : index
    %c1_39 = arith.constant 1 : index
    %c0_40 = arith.constant 0 : index
    %20 = vector.load %arg5[%c0_37, %c0_38, %c1_39, %c0_40] : memref<2x10x10x128xf32, #tpu.memory_space<vmem>>, vector<2x8x8x128xf32>
    %c0_41 = arith.constant 0 : index
    %c0_42 = arith.constant 0 : index
    %c2 = arith.constant 2 : index
    %c0_43 = arith.constant 0 : index
    %21 = vector.load %arg5[%c0_41, %c0_42, %c2, %c0_43] : memref<2x10x10x128xf32, #tpu.memory_space<vmem>>, vector<2x8x8x128xf32>
    %c0_44 = arith.constant 0 : index
    %c1_45 = arith.constant 1 : index
    %c1_46 = arith.constant 1 : index
    %c0_47 = arith.constant 0 : index
    %22 = vector.load %arg5[%c0_44, %c1_45, %c1_46, %c0_47] : memref<2x10x10x128xf32, #tpu.memory_space<vmem>>, vector<2x8x8x128xf32>
    %c0_48 = arith.constant 0 : index
    %c1_49 = arith.constant 1 : index
    %c2_50 = arith.constant 2 : index
    %c0_51 = arith.constant 0 : index
    %23 = vector.load %arg5[%c0_48, %c1_49, %c2_50, %c0_51] : memref<2x10x10x128xf32, #tpu.memory_space<vmem>>, vector<2x8x8x128xf32>
    %24 = tpu.concatenate %20, %21, %22, %23 in 3 : vector<2x8x8x128xf32>, vector<2x8x8x128xf32>, vector<2x8x8x128xf32>, vector<2x8x8x128xf32> -> vector<2x8x8x512xf32>
    %25 = vector.shape_cast %24 : vector<2x8x8x512xf32> to vector<128x512xf32>
    %c1_52 = arith.constant 1 : index
    %c0_53 = arith.constant 0 : index
    %c0_54 = arith.constant 0 : index
    %26 = vector.load %arg2[%c1_52, %c0_53, %c0_54] : memref<4x512x128xf32, #tpu.memory_space<vmem>>, vector<1x512x128xf32>
    %27 = vector.shape_cast %26 : vector<1x512x128xf32> to vector<512x128xf32>
    %cst_55 = arith.constant dense<0.000000e+00> : vector<128x128xf32>
    %28 = tpu.matmul %25, %27, %cst_55 {dimension_numbers = #tpu.dot_dimension_numbers<[1], [0], [0], [1], [0, 0, 1, 1], [], []>} : vector<128x512xf32>, vector<512x128xf32>, vector<128x128xf32> -> vector<128x128xf32>
    %29 = vector.broadcast %4 : vector<1x128xf32> to vector<128x128xf32>
    %30 = arith.addf %28, %29 : vector<128x128xf32>
    %31 = vector.shape_cast %30 : vector<128x128xf32> to vector<2x8x8x128xf32>
    %c0_56 = arith.constant 0 : index
    %c0_57 = arith.constant 0 : index
    %c0_58 = arith.constant 0 : index
    %c0_59 = arith.constant 0 : index
    %c128 = arith.constant 128 : index
    %32 = vector.load %arg4[%c0_56, %c0_57, %c0_58, %c0_59, %c128] : memref<2x8x2x8x256xf32, #tpu.memory_space<vmem>>, vector<2x8x1x8x128xf32>
    %33 = vector.shape_cast %32 : vector<2x8x1x8x128xf32> to vector<2x8x8x128xf32>
    %34 = vector.shape_cast %31 : vector<2x8x8x128xf32> to vector<2x8x1x8x128xf32>
    tpu.vector_store %arg4[%c0_56, %c0_57, %c0_58, %c0_59, %c128], %34 {strides = array<i32>} : memref<2x8x2x8x256xf32, #tpu.memory_space<vmem>>, vector<2x8x1x8x128xf32>,
    %c0_60 = arith.constant 0 : index
    %c1_61 = arith.constant 1 : index
    %c0_62 = arith.constant 0 : index
    %c0_63 = arith.constant 0 : index
    %35 = vector.load %arg5[%c0_60, %c1_61, %c0_62, %c0_63] : memref<2x10x10x128xf32, #tpu.memory_space<vmem>>, vector<2x8x8x128xf32>
    %c0_64 = arith.constant 0 : index
    %c1_65 = arith.constant 1 : index
    %c1_66 = arith.constant 1 : index
    %c0_67 = arith.constant 0 : index
    %36 = vector.load %arg5[%c0_64, %c1_65, %c1_66, %c0_67] : memref<2x10x10x128xf32, #tpu.memory_space<vmem>>, vector<2x8x8x128xf32>
    %c0_68 = arith.constant 0 : index
    %c2_69 = arith.constant 2 : index
    %c0_70 = arith.constant 0 : index
    %c0_71 = arith.constant 0 : index
    %37 = vector.load %arg5[%c0_68, %c2_69, %c0_70, %c0_71] : memref<2x10x10x128xf32, #tpu.memory_space<vmem>>, vector<2x8x8x128xf32>
    %c0_72 = arith.constant 0 : index
    %c2_73 = arith.constant 2 : index
    %c1_74 = arith.constant 1 : index
    %c0_75 = arith.constant 0 : index
    %38 = vector.load %arg5[%c0_72, %c2_73, %c1_74, %c0_75] : memref<2x10x10x128xf32, #tpu.memory_space<vmem>>, vector<2x8x8x128xf32>
    %39 = tpu.concatenate %35, %36, %37, %38 in 3 : vector<2x8x8x128xf32>, vector<2x8x8x128xf32>, vector<2x8x8x128xf32>, vector<2x8x8x128xf32> -> vector<2x8x8x512xf32>
    %40 = vector.shape_cast %39 : vector<2x8x8x512xf32> to vector<128x512xf32>
    %c2_76 = arith.constant 2 : index
    %c0_77 = arith.constant 0 : index
    %c0_78 = arith.constant 0 : index
    %41 = vector.load %arg2[%c2_76, %c0_77, %c0_78] : memref<4x512x128xf32, #tpu.memory_space<vmem>>, vector<1x512x128xf32>
    %42 = vector.shape_cast %41 : vector<1x512x128xf32> to vector<512x128xf32>
    %cst_79 = arith.constant dense<0.000000e+00> : vector<128x128xf32>
    %43 = tpu.matmul %40, %42, %cst_79 {dimension_numbers = #tpu.dot_dimension_numbers<[1], [0], [0], [1], [0, 0, 1, 1], [], []>} : vector<128x512xf32>, vector<512x128xf32>, vector<128x128xf32> -> vector<128x128xf32>
    %44 = vector.broadcast %4 : vector<1x128xf32> to vector<128x128xf32>
    %45 = arith.addf %43, %44 : vector<128x128xf32>
    %46 = vector.shape_cast %45 : vector<128x128xf32> to vector<2x8x8x128xf32>
    %c0_80 = arith.constant 0 : index
    %c0_81 = arith.constant 0 : index
    %c1_82 = arith.constant 1 : index
    %c0_83 = arith.constant 0 : index
    %c0_84 = arith.constant 0 : index
    %47 = vector.load %arg4[%c0_80, %c0_81, %c1_82, %c0_83, %c0_84] : memref<2x8x2x8x256xf32, #tpu.memory_space<vmem>>, vector<2x8x1x8x128xf32>
    %48 = vector.shape_cast %47 : vector<2x8x1x8x128xf32> to vector<2x8x8x128xf32>
    %49 = vector.shape_cast %46 : vector<2x8x8x128xf32> to vector<2x8x1x8x128xf32>
    tpu.vector_store %arg4[%c0_80, %c0_81, %c1_82, %c0_83, %c0_84], %49 {strides = array<i32>} : memref<2x8x2x8x256xf32, #tpu.memory_space<vmem>>, vector<2x8x1x8x128xf32>,
    %c0_85 = arith.constant 0 : index
    %c1_86 = arith.constant 1 : index
    %c1_87 = arith.constant 1 : index
    %c0_88 = arith.constant 0 : index
    %50 = vector.load %arg5[%c0_85, %c1_86, %c1_87, %c0_88] : memref<2x10x10x128xf32, #tpu.memory_space<vmem>>, vector<2x8x8x128xf32>
    %c0_89 = arith.constant 0 : index
    %c1_90 = arith.constant 1 : index
    %c2_91 = arith.constant 2 : index
    %c0_92 = arith.constant 0 : index
    %51 = vector.load %arg5[%c0_89, %c1_90, %c2_91, %c0_92] : memref<2x10x10x128xf32, #tpu.memory_space<vmem>>, vector<2x8x8x128xf32>
    %c0_93 = arith.constant 0 : index
    %c2_94 = arith.constant 2 : index
    %c1_95 = arith.constant 1 : index
    %c0_96 = arith.constant 0 : index
    %52 = vector.load %arg5[%c0_93, %c2_94, %c1_95, %c0_96] : memref<2x10x10x128xf32, #tpu.memory_space<vmem>>, vector<2x8x8x128xf32>
    %c0_97 = arith.constant 0 : index
    %c2_98 = arith.constant 2 : index
    %c2_99 = arith.constant 2 : index
    %c0_100 = arith.constant 0 : index
    %53 = vector.load %arg5[%c0_97, %c2_98, %c2_99, %c0_100] : memref<2x10x10x128xf32, #tpu.memory_space<vmem>>, vector<2x8x8x128xf32>
    %54 = tpu.concatenate %50, %51, %52, %53 in 3 : vector<2x8x8x128xf32>, vector<2x8x8x128xf32>, vector<2x8x8x128xf32>, vector<2x8x8x128xf32> -> vector<2x8x8x512xf32>
    %55 = vector.shape_cast %54 : vector<2x8x8x512xf32> to vector<128x512xf32>
    %c3 = arith.constant 3 : index
    %c0_101 = arith.constant 0 : index
    %c0_102 = arith.constant 0 : index
    %56 = vector.load %arg2[%c3, %c0_101, %c0_102] : memref<4x512x128xf32, #tpu.memory_space<vmem>>, vector<1x512x128xf32>
    %57 = vector.shape_cast %56 : vector<1x512x128xf32> to vector<512x128xf32>
    %cst_103 = arith.constant dense<0.000000e+00> : vector<128x128xf32>
    %58 = tpu.matmul %55, %57, %cst_103 {dimension_numbers = #tpu.dot_dimension_numbers<[1], [0], [0], [1], [0, 0, 1, 1], [], []>} : vector<128x512xf32>, vector<512x128xf32>, vector<128x128xf32> -> vector<128x128xf32>
    %59 = vector.broadcast %4 : vector<1x128xf32> to vector<128x128xf32>
    %60 = arith.addf %58, %59 : vector<128x128xf32>
    %61 = vector.shape_cast %60 : vector<128x128xf32> to vector<2x8x8x128xf32>
    %c0_104 = arith.constant 0 : index
    %c0_105 = arith.constant 0 : index
    %c1_106 = arith.constant 1 : index
    %c0_107 = arith.constant 0 : index
    %c128_108 = arith.constant 128 : index
    %62 = vector.load %arg4[%c0_104, %c0_105, %c1_106, %c0_107, %c128_108] : memref<2x8x2x8x256xf32, #tpu.memory_space<vmem>>, vector<2x8x1x8x128xf32>
    %63 = vector.shape_cast %62 : vector<2x8x1x8x128xf32> to vector<2x8x8x128xf32>
    %64 = vector.shape_cast %61 : vector<2x8x8x128xf32> to vector<2x8x1x8x128xf32>
    tpu.vector_store %arg4[%c0_104, %c0_105, %c1_106, %c0_107, %c128_108], %64 {strides = array<i32>} : memref<2x8x2x8x256xf32, #tpu.memory_space<vmem>>, vector<2x8x1x8x128xf32>,
    return
  }
  func.func @transform_0(%arg0: i32) -> (i32, i32, i32, i32) {
    %c0_i32 = arith.constant 0 : i32
    %c0_i32_0 = arith.constant 0 : i32
    %c0_i32_1 = arith.constant 0 : i32
    %c0_i32_2 = arith.constant 0 : i32
    return %arg0, %c0_i32, %c0_i32_0, %c0_i32_1 : i32, i32, i32, i32
  }
  func.func @transform_1(%arg0: i32) -> (i32, i32, i32) {
    %c0_i32 = arith.constant 0 : i32
    %c0_i32_0 = arith.constant 0 : i32
    %c0_i32_1 = arith.constant 0 : i32
    %c0_i32_2 = arith.constant 0 : i32
    return %c0_i32, %c0_i32_0, %c0_i32_1 : i32, i32, i32
  }
  func.func @transform_2(%arg0: i32) -> (i32, i32) {
    %c0_i32 = arith.constant 0 : i32
    %c0_i32_0 = arith.constant 0 : i32
    %c0_i32_1 = arith.constant 0 : i32
    return %c0_i32, %c0_i32_0 : i32, i32
  }
  func.func @transform_3(%arg0: i32) -> (i32, i32, i32, i32, i32) {
    %c0_i32 = arith.constant 0 : i32
    %c0_i32_0 = arith.constant 0 : i32
    %c0_i32_1 = arith.constant 0 : i32
    %c0_i32_2 = arith.constant 0 : i32
    %c0_i32_3 = arith.constant 0 : i32
    return %arg0, %c0_i32, %c0_i32_0, %c0_i32_1, %c0_i32_2 : i32, i32, i32, i32, i32
  }
}

</mosaic_0001>

<bundles_post_ra>
// kernel: tpu_custom_call.1
= control target key start
LH: loop header
LB: loop body
LE: loop exit
PB: predicated region body
PF: predicated region fallthrough
CT: control target
= control target key end

     0   :  { %8 = vsyncpa [#allocation4], 0  ;;  %s3373_s0 = inlined_call_operand.hbm [shape: f32[2,8,8,128], index: 0, kind: input, shape index: {}]   ;;  %s3374_s1 = inlined_call_operand.hbm [shape: f32[4,512,128], index: 1, kind: input, shape index: {}]   ;;  %s3375_s2 = inlined_call_operand.vmem [shape: f32[1,128], index: 2, kind: input, shape index: {}]   ;;  %s3376_s3 = inlined_call_operand.hbm [shape: f32[2,8,2,8,256], index: 3, kind: output, shape index: {}]  }
   0x1   :  { %9 = vsyncpa [#allocation7], 0 }
   0x2   :  { %10 = vsyncpa [#allocation5], 0  ;;  %s2868_s12 = smov [#allocation3]   ;;  %s2796_s16 = scalar_lea.hbm %s3373_s0, 2048 }
   0x3   :  { %s16_s13 = sshll.u32 %s2868_s12, 4  ;;  %p2797_p0 = scmp.ne.s32.totalorder %s3373_s0, %s2796_s16  ;;  %s17_s13 = int_to_ptr.vmem [resolvable:$true] %s16_s13 }
   0x4   :  { %p2800_p1 = scmp.lt.u32.totalorder %s2796_s16, %s3373_s0 }
   0x6   :  { %p2802_p2 = pnand %p2800_p1, %p2797_p0 }
   0x8   :  { %2805 = shalt.err (!%p2802_p2)
}
   0x9   :  { %s2806_s21 = scalar_lea.vmem %s17_s13, 2048  ;;  %p2811_p4 = scmp.lt.s32.totalorder %s17_s13, %s17_s13 }
   0xa   :  { %p2807_p3 = scmp.ne.s32.totalorder %s17_s13, %s2806_s21  ;;  %p2812_p5 = scmp.lt.s32.totalorder %s2806_s21, %s2806_s21 }
   0xc   :  { %p2813_p6 = por %p2812_p5, %p2811_p4 }
   0xe   :  { %p2814_p7 = pnand %p2813_p6, %p2807_p3 }
  0x10   :  { %2817 = shalt.err (!%p2814_p7)
}
  0x11   :  { %s2869_s22 = smov 128   ;;  %s2870_s23 = smov 8  }
  0x12   :  { %22 = dma.hbm_to_vmem [thread:$0]  %s3373_s0, 2048, %s17_s13, [#allocation4], %s2869_s22, %s2869_s22, %s2870_s23  }
  0x13   :  { %s2871_s26 = smov [#allocation6]   ;;  %s2818_s30 = scalar_lea.hbm %s3374_s1, 32768 }
  0x14   :  { %s28_s27 = sshll.u32 %s2871_s26, 4  ;;  %p2819_p8 = scmp.ne.s32.totalorder %s3374_s1, %s2818_s30  ;;  %s29_s27 = int_to_ptr.vmem [resolvable:$true] %s28_s27 }
  0x15   :  { %p2822_p9 = scmp.lt.u32.totalorder %s2818_s30, %s3374_s1 }
  0x17   :  { %p2824_p10 = pnand %p2822_p9, %p2819_p8 }
  0x19   :  { %2827 = shalt.err (!%p2824_p10)
}
  0x1a   :  { %s2828_s8 = scalar_lea.vmem %s29_s27, 32768  ;;  %p2833_p12 = scmp.lt.s32.totalorder %s29_s27, %s29_s27 }
  0x1b   :  { %p2829_p11 = scmp.ne.s32.totalorder %s29_s27, %s2828_s8  ;;  %p2834_p13 = scmp.lt.s32.totalorder %s2828_s8, %s2828_s8 }
  0x1d   :  { %p2835_p0 = por %p2834_p13, %p2833_p12 }
  0x1f   :  { %p2836_p1 = pnand %p2835_p0, %p2829_p11 }
  0x21   :  { %2839 = shalt.err (!%p2836_p1)
}
  0x22   :  { %34 = dma.hbm_to_vmem [thread:$0]  %s3374_s1, 32768, %s29_s27, [#allocation7], %s2869_s22, %s2869_s22, %s2870_s23  }
  0x23   :  { %2862 = dma.done.wait [#allocation4], 2048  }
  0x24   :  { %2863 = vsyncadd [#allocation4], 4294965248 }
  0x25   :  { %2864 = dma.done.wait [#allocation7], 32768  }
  0x26   :  { %2865 = vsyncadd [#allocation7], 4294934528  ;;  %v2872_v0 = vmov 0.0   ;;  %v197_v1 = vld [vmem:[#allocation6 + $0x80] sm:$0xff]  ;;  %v198_v2 = vld [vmem:[#allocation6 + $0x88] sm:$0xff] }
  0x27   :  { %43 = vst [vmem:[#allocation2] sm:$0xff] %v2872_v0  ;;  %44 = vst [vmem:[#allocation2 + $0x8] sm:$0x3] %v2872_v0  ;;  %v181_v3 = vld [vmem:[#allocation6] sm:$0xff]  ;;  %v2523_v4 = vpack.c.bf16 %v198_v2, %v197_v1  ;;  %v182_v5 = vld [vmem:[#allocation6 + $0x8] sm:$0xff] }
  0x28   :  { %45 = vst [vmem:[#allocation2 + $0x10] sm:$0xff] %v2872_v0  ;;  %46 = vst [vmem:[#allocation2 + $0x18] sm:$0x3] %v2872_v0  ;;  %v229_v6 = vld [vmem:[#allocation6 + $0x180] sm:$0xff]  ;;  %v230_v7 = vld [vmem:[#allocation6 + $0x188] sm:$0xff]  ;;  %v2525_v8 = vpack.c.bf16 %v182_v5, %v181_v3 }
  0x29   :  { %47 = vst [vmem:[#allocation2 + $0x20] sm:$0xff] %v2872_v0  ;;  %48 = vst [vmem:[#allocation2 + $0x28] sm:$0x3] %v2872_v0  ;;  %v2555_v9 = vpack.c.bf16 %v230_v7, %v229_v6  ;;  %v213_v10 = vld [vmem:[#allocation6 + $0x100] sm:$0xff]  ;;  %v214_v11 = vld [vmem:[#allocation6 + $0x108] sm:$0xff]  ;;  %2524 = vmatprep.subr.bf16.mxu0 %v2523_v4 }
  0x2a   :  { %49 = vst [vmem:[#allocation2 + $0x30] sm:$0xff] %v2872_v0  ;;  %50 = vst [vmem:[#allocation2 + $0x38] sm:$0x3] %v2872_v0  ;;  %v199_v12 = vld [vmem:[#allocation6 + $0x90] sm:$0xff]  ;;  %v2557_v13 = vpack.c.bf16 %v214_v11, %v213_v10  ;;  %v200_v14 = vld [vmem:[#allocation6 + $0x98] sm:$0xff]  ;;  %2526 = vmatpush3.bf16.msra.mxu0 %v2525_v8 }
  0x2b   :  { %51 = vst [vmem:[#allocation2 + $0x40] sm:$0xff] %v2872_v0  ;;  %52 = vst [vmem:[#allocation2 + $0x48] sm:$0x3] %v2872_v0  ;;  %v183_v15 = vld [vmem:[#allocation6 + $0x10] sm:$0xff]  ;;  %v184_v16 = vld [vmem:[#allocation6 + $0x18] sm:$0xff]  ;;  %2556 = vmatprep.subr.bf16.mxu1 %v2555_v9  ;;  %v2527_v17 = vpack.c.bf16 %v200_v14, %v199_v12 }
  0x2c   :  { %53 = vst [vmem:[#allocation2 + $0x50] sm:$0xff] %v2872_v0  ;;  %54 = vst [vmem:[#allocation2 + $0x58] sm:$0x3] %v2872_v0  ;;  %v2529_v18 = vpack.c.bf16 %v184_v16, %v183_v15  ;;  %v231_v19 = vld [vmem:[#allocation6 + $0x190] sm:$0xff]  ;;  %v232_v20 = vld [vmem:[#allocation6 + $0x198] sm:$0xff]  ;;  %2558 = vmatpush3.bf16.msra.mxu1 %v2557_v13 }
  0x2d   :  { %55 = vst [vmem:[#allocation2 + $0x60] sm:$0xff] %v2872_v0  ;;  %56 = vst [vmem:[#allocation2 + $0x68] sm:$0x3] %v2872_v0  ;;  %v215_v21 = vld [vmem:[#allocation6 + $0x110] sm:$0xff]  ;;  %v2559_v22 = vpack.c.bf16 %v232_v20, %v231_v19  ;;  %v216_v23 = vld [vmem:[#allocation6 + $0x118] sm:$0xff]  ;;  %2528 = vmatprep.subr.bf16.mxu0 %v2527_v17 }
  0x2e   :  { %57 = vst [vmem:[#allocation2 + $0x70] sm:$0xff] %v2872_v0  ;;  %58 = vst [vmem:[#allocation2 + $0x78] sm:$0x3] %v2872_v0  ;;  %v201_v24 = vld [vmem:[#allocation6 + $0xa0] sm:$0xff]  ;;  %v202_v25 = vld [vmem:[#allocation6 + $0xa8] sm:$0xff]  ;;  %v2561_v26 = vpack.c.bf16 %v216_v23, %v215_v21  ;;  %2530 = vmatpush3.bf16.msra.mxu0 %v2529_v18 }
  0x2f   :  { %59 = vst [vmem:[#allocation2 + $0x80] sm:$0xff] %v2872_v0  ;;  %60 = vst [vmem:[#allocation2 + $0x88] sm:$0x3] %v2872_v0  ;;  %v2531_v27 = vpack.c.bf16 %v202_v25, %v201_v24  ;;  %v185_v28 = vld [vmem:[#allocation6 + $0x20] sm:$0xff]  ;;  %v186_v29 = vld [vmem:[#allocation6 + $0x28] sm:$0xff]  ;;  %2560 = vmatprep.subr.bf16.mxu1 %v2559_v22 }
  0x30   :  { %61 = vst [vmem:[#allocation2 + $0x90] sm:$0xff] %v2872_v0  ;;  %62 = vst [vmem:[#allocation2 + $0x98] sm:$0x3] %v2872_v0  ;;  %v233_v30 = vld [vmem:[#allocation6 + $0x1a0] sm:$0xff]  ;;  %v234_v31 = vld [vmem:[#allocation6 + $0x1a8] sm:$0xff]  ;;  %v2533_v34 = vpack.c.bf16 %v186_v29, %v185_v28  ;;  %2562 = vmatpush3.bf16.msra.mxu1 %v2561_v26 }
  0x31   :  { %63 = vst [vmem:[#allocation2 + $0xa0] sm:$0xff] %v2872_v0  ;;  %64 = vst [vmem:[#allocation2 + $0xa8] sm:$0x3] %v2872_v0  ;;  %v217_v32 = vld [vmem:[#allocation6 + $0x120] sm:$0xff]  ;;  %v218_v33 = vld [vmem:[#allocation6 + $0x128] sm:$0xff]  ;;  %v2563_v35 = vpack.c.bf16 %v234_v31, %v233_v30  ;;  %2532 = vmatprep.subr.bf16.mxu0 %v2531_v27 }
  0x32   :  { %65 = vst [vmem:[#allocation2 + $0xb0] sm:$0xff] %v2872_v0  ;;  %66 = vst [vmem:[#allocation2 + $0xb8] sm:$0x3] %v2872_v0  ;;  %v203_v36 = vld [vmem:[#allocation6 + $0xb0] sm:$0xff]  ;;  %v204_v37 = vld [vmem:[#allocation6 + $0xb8] sm:$0xff]  ;;  %v2565_v39 = vpack.c.bf16 %v218_v33, %v217_v32  ;;  %2534 = vmatpush3.bf16.msra.mxu0 %v2533_v34 }
  0x33   :  { %67 = vst [vmem:[#allocation2 + $0xc0] sm:$0xff] %v2872_v0  ;;  %68 = vst [vmem:[#allocation2 + $0xc8] sm:$0x3] %v2872_v0  ;;  %v187_v38 = vld [vmem:[#allocation6 + $0x30] sm:$0xff]  ;;  %v2535_v40 = vpack.c.bf16 %v204_v37, %v203_v36  ;;  %v188_v41 = vld [vmem:[#allocation6 + $0x38] sm:$0xff]  ;;  %2564 = vmatprep.subr.bf16.mxu1 %v2563_v35 }
  0x34   :  { %69 = vst [vmem:[#allocation2 + $0xd0] sm:$0xff] %v2872_v0  ;;  %70 = vst [vmem:[#allocation2 + $0xd8] sm:$0x3] %v2872_v0  ;;  %v235_v42 = vld [vmem:[#allocation6 + $0x1b0] sm:$0xff]  ;;  %v236_v43 = vld [vmem:[#allocation6 + $0x1b8] sm:$0xff]  ;;  %v2537_v49 = vpack.c.bf16 %v188_v41, %v187_v38  ;;  %2566 = vmatpush3.bf16.msra.mxu1 %v2565_v39 }
  0x35   :  { %71 = vst [vmem:[#allocation2 + $0xe0] sm:$0xff] %v2872_v0  ;;  %72 = vst [vmem:[#allocation2 + $0xe8] sm:$0x3] %v2872_v0  ;;  %v2567_v44 = vpack.c.bf16 %v236_v43, %v235_v42  ;;  %v219_v45 = vld [vmem:[#allocation6 + $0x130] sm:$0xff]  ;;  %v220_v46 = vld [vmem:[#allocation6 + $0x138] sm:$0xff]  ;;  %2536 = vmatprep.subr.bf16.mxu0 %v2535_v40 }
  0x36   :  { %73 = vst [vmem:[#allocation2 + $0xf0] sm:$0xff] %v2872_v0  ;;  %74 = vst [vmem:[#allocation2 + $0xf8] sm:$0x3] %v2872_v0  ;;  %v205_v47 = vld [vmem:[#allocation6 + $0xc0] sm:$0xff]  ;;  %v206_v48 = vld [vmem:[#allocation6 + $0xc8] sm:$0xff]  ;;  %v2569_v52 = vpack.c.bf16 %v220_v46, %v219_v45  ;;  %2538 = vmatpush3.bf16.msra.mxu0 %v2537_v49 }
  0x37   :  { %75 = vst [vmem:[#allocation2 + $0x100] sm:$0xff] %v2872_v0  ;;  %76 = vst [vmem:[#allocation2 + $0x108] sm:$0x3] %v2872_v0  ;;  %v237_v50 = vld [vmem:[#allocation6 + $0x1c0] sm:$0xff]  ;;  %v238_v51 = vld [vmem:[#allocation6 + $0x1c8] sm:$0xff]  ;;  %v2539_v53 = vpack.c.bf16 %v206_v48, %v205_v47  ;;  %2568 = vmatprep.subr.bf16.mxu1 %v2567_v44 }
  0x38   :  { %77 = vst [vmem:[#allocation2 + $0x110] sm:$0xff] %v2872_v0  ;;  %78 = vst [vmem:[#allocation2 + $0x118] sm:$0x3] %v2872_v0  ;;  %v189_v54 = vld [vmem:[#allocation6 + $0x40] sm:$0xff]  ;;  %v190_v55 = vld [vmem:[#allocation6 + $0x48] sm:$0xff]  ;;  %v2571_v57 = vpack.c.bf16 %v238_v51, %v237_v50  ;;  %2570 = vmatpush3.bf16.msra.mxu1 %v2569_v52 }
  0x39   :  { %79 = vst [vmem:[#allocation2 + $0x120] sm:$0xff] %v2872_v0  ;;  %80 = vst [vmem:[#allocation2 + $0x128] sm:$0x3] %v2872_v0  ;;  %v221_v56 = vld [vmem:[#allocation6 + $0x140] sm:$0xff]  ;;  %v222_v58 = vld [vmem:[#allocation6 + $0x148] sm:$0xff]  ;;  %v2541_v63 = vpack.c.bf16 %v190_v55, %v189_v54  ;;  %2540 = vmatprep.subr.bf16.mxu0 %v2539_v53 }
  0x3a   :  { %81 = vst [vmem:[#allocation2 + $0x130] sm:$0xff] %v2872_v0  ;;  %82 = vst [vmem:[#allocation2 + $0x138] sm:$0x3] %v2872_v0  ;;  %v207_v59 = vld [vmem:[#allocation6 + $0xd0] sm:$0xff]  ;;  %v208_v60 = vld [vmem:[#allocation6 + $0xd8] sm:$0xff]  ;;  %v2573_v1 = vpack.c.bf16 %v222_v58, %v221_v56  ;;  %2572 = vmatprep.subr.bf16.mxu1 %v2571_v57 }
  0x3b   :  { %v239_v61 = vld [vmem:[#allocation6 + $0x1d0] sm:$0xff]  ;;  %v240_v62 = vld [vmem:[#allocation6 + $0x1d8] sm:$0xff]  ;;  %v2543_v2 = vpack.c.bf16 %v208_v60, %v207_v59  ;;  %v209_v8 = vld [vmem:[#allocation6 + $0xe0] sm:$0xff]  ;;  %2542 = vmatpush3.bf16.msra.mxu0 %v2541_v63 }
  0x3c   :  { %v191_v3 = vld [vmem:[#allocation6 + $0x50] sm:$0xff]  ;;  %v192_v4 = vld [vmem:[#allocation6 + $0x58] sm:$0xff]  ;;  %v2575_v6 = vpack.c.bf16 %v240_v62, %v239_v61  ;;  %v210_v9 = vld [vmem:[#allocation6 + $0xe8] sm:$0xff]  ;;  %2574 = vmatpush3.bf16.msra.mxu1 %v2573_v1 }
  0x3d   :  { %v223_v5 = vld [vmem:[#allocation6 + $0x150] sm:$0xff]  ;;  %v224_v7 = vld [vmem:[#allocation6 + $0x158] sm:$0xff]  ;;  %v241_v10 = vld [vmem:[#allocation6 + $0x1e0] sm:$0xff]  ;;  %v2545_v12 = vpack.c.bf16 %v192_v4, %v191_v3  ;;  %2544 = vmatprep.subr.bf16.mxu0 %v2543_v2  ;;  %v2547_v16 = vpack.c.bf16 %v210_v9, %v209_v8 }
  0x3e   :  { %v242_v11 = vld [vmem:[#allocation6 + $0x1e8] sm:$0xff]  ;;  %v193_v13 = vld [vmem:[#allocation6 + $0x60] sm:$0xff]  ;;  %v2577_v15 = vpack.c.bf16 %v224_v7, %v223_v5  ;;  %2576 = vmatprep.subr.bf16.mxu1 %v2575_v6  ;;  %v211_v21 = vld [vmem:[#allocation6 + $0xf0] sm:$0xff] }
  0x3f   :  { %v2960_v14 = vld [vmem:[#allocation2 + $0x1] sm:$0xff]  ;;  %v2579_v20 = vpack.c.bf16 %v242_v11, %v241_v10  ;;  %v212_v22 = vld [vmem:[#allocation6 + $0xf8] sm:$0xff]  ;;  %v243_v24 = vld [vmem:[#allocation6 + $0x1f0] sm:$0xff]  ;;  %2546 = vmatpush3.bf16.msra.mxu0 %v2545_v12 }
  0x40   :  { %v194_v17 = vld [vmem:[#allocation6 + $0x68] sm:$0xff]  ;;  %v225_v18 = vld [vmem:[#allocation6 + $0x160] sm:$0xff]  ;;  %315 = vmatprep.mubr.f32.mxu0 %v2960_v14  ;;  %v244_v25 = vld [vmem:[#allocation6 + $0x1f8] sm:$0xff]  ;;  %2578 = vmatpush3.bf16.msra.mxu1 %v2577_v15  ;;  %v2551_v30 = vpack.c.bf16 %v212_v22, %v211_v21 }
  0x41   :  { %v226_v19 = vld [vmem:[#allocation6 + $0x168] sm:$0xff]  ;;  %v2963_v23 = vld [vmem:[#allocation3] sm:$0xff]  ;;  %v2549_v26 = vpack.c.bf16 %v194_v17, %v193_v13  ;;  %v195_v27 = vld [vmem:[#allocation6 + $0x70] sm:$0xff]  ;;  %2548 = vmatprep.subr.bf16.mxu0 %v2547_v16  ;;  %2580 = vmatprep.subr.bf16.mxu1 %v2579_v20  ;;  %v2583_v34 = vpack.c.bf16 %v244_v25, %v243_v24 }
  0x42   :  { %100 = vst [vmem:[#allocation2 + $0x11] sm:$0xff] %v2963_v23  ;;  %460 = vmatprep.mubr.f32.mxu1 %v2963_v23  ;;  %v2967_v28 = vld [vmem:[#allocation3 + $0x8] sm:$0xff]  ;;  %v2581_v29 = vpack.c.bf16 %v226_v19, %v225_v18  ;;  %v196_v31 = vld [vmem:[#allocation6 + $0x78] sm:$0xff]  ;;  %v227_v32 = vld [vmem:[#allocation6 + $0x170] sm:$0xff] }
  0x43   :  { %101 = vst [vmem:[#allocation2 + $0x21] sm:$0xff] %v2967_v28  ;;  %v2970_v33 = vld [vmem:[#allocation3 + $0x10] sm:$0xff]  ;;  %v228_v35 = vld [vmem:[#allocation6 + $0x178] sm:$0xff]  ;;  %v638_v36 = vld [vmem:[#allocation6 + $0x280] sm:$0xff]  ;;  %2550 = vmatpush3.bf16.msra.mxu0 %v2549_v26  ;;  %v2553_v40 = vpack.c.bf16 %v196_v31, %v195_v27 }
  0x44   :  { %v639_v37 = vld [vmem:[#allocation6 + $0x288] sm:$0xff]  ;;  %102 = vst [vmem:[#allocation2 + $0x31] sm:$0xff] %v2970_v33  ;;  %v670_v38 = vld [vmem:[#allocation6 + $0x380] sm:$0xff]  ;;  %v2973_v41 = vld [vmem:[#allocation3 + $0x18] sm:$0xff]  ;;  %2582 = vmatpush3.bf16.msra.mxu1 %v2581_v29  ;;  %2552 = vmatprep.subr.bf16.mxu0 %v2551_v30  ;;  %v2585_v42 = vpack.c.bf16 %v228_v35, %v227_v32 }
  0x45   :  { %v671_v39 = vld [vmem:[#allocation6 + $0x388] sm:$0xff]  ;;  %v2587_v43 = vpack.c.bf16 %v639_v37, %v638_v36  ;;  %v622_v44 = vld [vmem:[#allocation6 + $0x200] sm:$0xff]  ;;  %103 = vst [vmem:[#allocation2 + $0x41] sm:$0xff] %v2973_v41  ;;  %2584 = vmatprep.subr.bf16.mxu1 %v2583_v34  ;;  %v640_v50 = vld [vmem:[#allocation6 + $0x290] sm:$0xff] }
  0x46   :  { %v623_v45 = vld [vmem:[#allocation6 + $0x208] sm:$0xff]  ;;  %v2976_v46 = vld [vmem:[#allocation3 + $0x20] sm:$0xff]  ;;  %v2619_v47 = vpack.c.bf16 %v671_v39, %v670_v38  ;;  %v641_v51 = vld [vmem:[#allocation6 + $0x298] sm:$0xff] }
  0x47   :  { %v654_v48 = vld [vmem:[#allocation6 + $0x300] sm:$0xff]  ;;  %v655_v49 = vld [vmem:[#allocation6 + $0x308] sm:$0xff]  ;;  %104 = vst [vmem:[#allocation2 + $0x51] sm:$0xff] %v2976_v46  ;;  %2554 = vmatpush3.bf16.msra.mxu0 %v2553_v40  ;;  %v2589_v53 = vpack.c.bf16 %v623_v45, %v622_v44  ;;  %v672_v54 = vld [vmem:[#allocation6 + $0x390] sm:$0xff]  ;;  %v2591_v60 = vpack.c.bf16 %v641_v51, %v640_v50 }
  0x48   :  { %v2979_v52 = vld [vmem:[#allocation3 + $0x28] sm:$0xff]  ;;  %v673_v55 = vld [vmem:[#allocation6 + $0x398] sm:$0xff]  ;;  %2586 = vmatpush3.bf16.msra.mxu1 %v2585_v42  ;;  %2588 = vmatprep.subr.bf16.mxu0 %v2587_v43  ;;  %v2621_v57 = vpack.c.bf16 %v655_v49, %v654_v48  ;;  %v624_v58 = vld [vmem:[#allocation6 + $0x210] sm:$0xff] }
  0x49   :  { %105 = vst [vmem:[#allocation2 + $0x61] sm:$0xff] %v2979_v52  ;;  %v149_v56 = vld [vmem:[#allocation2 + $0x10] sm:$0xff]  ;;  %2620 = vmatprep.subr.bf16.mxu1 %v2619_v47  ;;  %v625_v61 = vld [vmem:[#allocation6 + $0x218] sm:$0xff]  ;;  %v2623_v1 = vpack.c.bf16 %v673_v55, %v672_v54  ;;  %v642_v2 = vld [vmem:[#allocation6 + $0x2a0] sm:$0xff] }
  0x4a   :  { %v2982_v59 = vld [vmem:[#allocation3 + $0x30] sm:$0xff]  ;;  %v657_v63 = vld [vmem:[#allocation6 + $0x318] sm:$0xff]  ;;  %316 = vmatmul.mubr.f32.vlgmr.msra.gmra.mrb[0].mxu0 %v2872_v0  ;;  %v643_v3 = vld [vmem:[#allocation6 + $0x2a8] sm:$0xff]  ;;  %v2593_v8 = vpack.c.bf16 %v625_v61, %v624_v58 }
  0x4b   :  { %v656_v62 = vld [vmem:[#allocation6 + $0x310] sm:$0xff]  ;;  %106 = vst [vmem:[#allocation2 + $0x71] sm:$0xff] %v2982_v59  ;;  %v2986_v4 = vld [vmem:[#allocation3 + $0x38] sm:$0xff]  ;;  %2590 = vmatpush3.bf16.msra.mxu0 %v2589_v53  ;;  %461 = vmatmul.mubr.f32.vlgmr.msra.gmra.mrb[0].mxu1 %v149_v56  ;;  %v674_v5 = vld [vmem:[#allocation6 + $0x3a0] sm:$0xff]  ;;  %v2595_v11 = vpack.c.bf16 %v643_v3, %v642_v2 }
  0x4c   :  { %v675_v6 = vld [vmem:[#allocation6 + $0x3a8] sm:$0xff]  ;;  %107 = vst [vmem:[#allocation2 + $0x81] sm:$0xff] %v2986_v4  ;;  %320 = vmatprep.mubr.f32.mxu0 %v2963_v23  ;;  %2622 = vmatpush3.bf16.msra.mxu1 %v2621_v57  ;;  %v150_v7 = vld [vmem:[#allocation2 + $0x20] sm:$0xff]  ;;  %v2625_v10 = vpack.c.bf16 %v657_v63, %v656_v62  ;;  %v644_v18 = vld [vmem:[#allocation6 + $0x2b0] sm:$0xff] }
  0x4d   :  { %v2990_v9 = vld [vmem:[#allocation3 + $0x40] sm:$0xff]  ;;  %465 = vmatprep.mubr.f32.mxu1 %v2967_v28  ;;  %2592 = vmatprep.subr.bf16.mxu0 %v2591_v60  ;;  %v627_v13 = vld [vmem:[#allocation6 + $0x228] sm:$0xff]  ;;  %v2627_v16 = vpack.c.bf16 %v675_v6, %v674_v5  ;;  %v645_v19 = vld [vmem:[#allocation6 + $0x2b8] sm:$0xff] }
  0x4e   :  { %v626_v12 = vld [vmem:[#allocation6 + $0x220] sm:$0xff]  ;;  %108 = vst [vmem:[#allocation2 + $0xb1] sm:$0xff] %v2990_v9  ;;  %321 = vmatmul.mubr.f32.gmra.mrb[2].mxu0 %v149_v56  ;;  %2624 = vmatprep.subr.bf16.mxu1 %v2623_v1  ;;  %v659_v17 = vld [vmem:[#allocation6 + $0x328] sm:$0xff]  ;;  %v676_v20 = vld [vmem:[#allocation6 + $0x3b0] sm:$0xff]  ;;  %v2599_v29 = vpack.c.bf16 %v645_v19, %v644_v18 }
  0x4f   :  { %v658_v15 = vld [vmem:[#allocation6 + $0x320] sm:$0xff]  ;;  %466 = vmatmul.mubr.f32.gmra.mrb[2].mxu1 %v150_v7  ;;  %325 = vmatprep.mubr.f32.mxu0 %v2967_v28  ;;  %v677_v21 = vld [vmem:[#allocation6 + $0x3b8] sm:$0xff]  ;;  %v2995_v22 = vld [vmem:[#allocation3 + $0x48] sm:$0xff]  ;;  %v2597_v25 = vpack.c.bf16 %v627_v13, %v626_v12 }
  0x50   :  { %470 = vmatprep.mubr.f32.mxu1 %v2970_v33  ;;  %2594 = vmatpush3.bf16.msra.mxu0 %v2593_v8  ;;  %v151_v24 = vld [vmem:[#allocation2 + $0x30] sm:$0xff]  ;;  %109 = vst [vmem:[#allocation2 + $0xc1] sm:$0xff] %v2995_v22  ;;  %v2629_v27 = vpack.c.bf16 %v659_v17, %v658_v15  ;;  %v629_v31 = vld [vmem:[#allocation6 + $0x238] sm:$0xff]  ;;  %v2631_v34 = vpack.c.bf16 %v677_v21, %v676_v20  ;;  %v646_v36 = vld [vmem:[#allocation6 + $0x2c0] sm:$0xff] }
  0x51   :  { %v2999_v26 = vld [vmem:[#allocation3 + $0x50] sm:$0xff]  ;;  %2626 = vmatpush3.bf16.msra.mxu1 %v2625_v10  ;;  %2596 = vmatprep.subr.bf16.mxu0 %v2595_v11  ;;  %v661_v35 = vld [vmem:[#allocation6 + $0x338] sm:$0xff]  ;;  %v647_v37 = vld [vmem:[#allocation6 + $0x2c8] sm:$0xff] }
  0x52   :  { %v628_v30 = vld [vmem:[#allocation6 + $0x230] sm:$0xff]  ;;  %110 = vst [vmem:[#allocation2 + $0xd1] sm:$0xff] %v2999_v26  ;;  %326 = vmatmul.mubr.f32.gmra.mrb[4].mxu0 %v150_v7  ;;  %2628 = vmatprep.subr.bf16.mxu1 %v2627_v16  ;;  %v678_v38 = vld [vmem:[#allocation6 + $0x3c0] sm:$0xff]  ;;  %v679_v39 = vld [vmem:[#allocation6 + $0x3c8] sm:$0xff]  ;;  %v2603_v47 = vpack.c.bf16 %v647_v37, %v646_v36 }
  0x53   :  { %v660_v32 = vld [vmem:[#allocation6 + $0x330] sm:$0xff]  ;;  %471 = vmatmul.mubr.f32.gmra.mrb[4].mxu1 %v151_v24  ;;  %330 = vmatprep.mubr.f32.mxu0 %v2970_v33  ;;  %v3003_v40 = vld [vmem:[#allocation3 + $0x58] sm:$0xff]  ;;  %v152_v42 = vld [vmem:[#allocation2 + $0x40] sm:$0xff]  ;;  %v2601_v43 = vpack.c.bf16 %v629_v31, %v628_v30  ;;  %v2635_v51 = vpack.c.bf16 %v679_v39, %v678_v38 }
  0x54   :  { %475 = vmatprep.mubr.f32.mxu1 %v2973_v41  ;;  %2598 = vmatpush3.bf16.msra.mxu0 %v2597_v25  ;;  %111 = vst [vmem:[#allocation2 + $0xe1] sm:$0xff] %v3003_v40  ;;  %v3007_v44 = vld [vmem:[#allocation3 + $0x60] sm:$0xff]  ;;  %v2633_v45 = vpack.c.bf16 %v661_v35, %v660_v32  ;;  %v631_v49 = vld [vmem:[#allocation6 + $0x248] sm:$0xff]  ;;  %v648_v54 = vld [vmem:[#allocation6 + $0x2d0] sm:$0xff] }
  0x55   :  { %2630 = vmatpush3.bf16.msra.mxu1 %v2629_v27  ;;  %2600 = vmatprep.subr.bf16.mxu0 %v2599_v29  ;;  %v630_v48 = vld [vmem:[#allocation6 + $0x240] sm:$0xff]  ;;  %112 = vst [vmem:[#allocation2 + $0xf1] sm:$0xff] %v3007_v44  ;;  %v663_v53 = vld [vmem:[#allocation6 + $0x348] sm:$0xff]  ;;  %v649_v55 = vld [vmem:[#allocation6 + $0x2d8] sm:$0xff] }
  0x56   :  { %v662_v50 = vld [vmem:[#allocation6 + $0x340] sm:$0xff]  ;;  %331 = vmatmul.mubr.f32.gmra.mrb[6].mxu0 %v151_v24  ;;  %2632 = vmatprep.subr.bf16.mxu1 %v2631_v34  ;;  %v680_v56 = vld [vmem:[#allocation6 + $0x3d0] sm:$0xff]  ;;  %v681_v57 = vld [vmem:[#allocation6 + $0x3d8] sm:$0xff]  ;;  %v2605_v61 = vpack.c.bf16 %v631_v49, %v630_v48  ;;  %v2607_v1 = vpack.c.bf16 %v649_v55, %v648_v54 }
  0x57   :  { %476 = vmatmul.mubr.f32.gmra.mrb[6].mxu1 %v152_v42  ;;  %335 = vmatprep.mubr.f32.mxu0 %v2973_v41  ;;  %v3011_v58 = vld [vmem:[#allocation3 + $0x68] sm:$0xff]  ;;  %v153_v60 = vld [vmem:[#allocation2 + $0x50] sm:$0xff]  ;;  %v2637_v63 = vpack.c.bf16 %v663_v53, %v662_v50  ;;  %v633_v3 = vld [vmem:[#allocation6 + $0x258] sm:$0xff]  ;;  %v2639_v6 = vpack.c.bf16 %v681_v57, %v680_v56 }
  0x58   :  { %480 = vmatprep.mubr.f32.mxu1 %v2976_v46  ;;  %2602 = vmatpush3.bf16.msra.mxu0 %v2601_v43  ;;  %113 = vst [vmem:[#allocation2 + $0x101] sm:$0xff] %v3011_v58  ;;  %v3015_v62 = vld [vmem:[#allocation3 + $0x70] sm:$0xff]  ;;  %v665_v7 = vld [vmem:[#allocation6 + $0x358] sm:$0xff]  ;;  %v650_v8 = vld [vmem:[#allocation6 + $0x2e0] sm:$0xff] }
  0x59   :  { %2634 = vmatpush3.bf16.msra.mxu1 %v2633_v45  ;;  %2604 = vmatprep.subr.bf16.mxu0 %v2603_v47  ;;  %v632_v2 = vld [vmem:[#allocation6 + $0x250] sm:$0xff]  ;;  %114 = vst [vmem:[#allocation2 + $0x111] sm:$0xff] %v3015_v62  ;;  %v651_v10 = vld [vmem:[#allocation6 + $0x2e8] sm:$0xff]  ;;  %v682_v11 = vld [vmem:[#allocation6 + $0x3e0] sm:$0xff] }
  0x5a   :  { %v664_v5 = vld [vmem:[#allocation6 + $0x350] sm:$0xff]  ;;  %336 = vmatmul.mubr.f32.gmra.mrb[8].mxu0 %v152_v42  ;;  %2636 = vmatprep.subr.bf16.mxu1 %v2635_v51  ;;  %v683_v12 = vld [vmem:[#allocation6 + $0x3e8] sm:$0xff]  ;;  %v3019_v13 = vld [vmem:[#allocation3 + $0x78] sm:$0xff]  ;;  %v2609_v16 = vpack.c.bf16 %v633_v3, %v632_v2  ;;  %v2611_v18 = vpack.c.bf16 %v651_v10, %v650_v8 }
  0x5b   :  { %481 = vmatmul.mubr.f32.gmra.mrb[8].mxu1 %v153_v60  ;;  %340 = vmatprep.mubr.f32.mxu0 %v2976_v46  ;;  %v154_v15 = vld [vmem:[#allocation2 + $0x60] sm:$0xff]  ;;  %115 = vst [vmem:[#allocation2 + $0x121] sm:$0xff] %v3019_v13  ;;  %v2641_v17 = vpack.c.bf16 %v665_v7, %v664_v5  ;;  %v635_v20 = vld [vmem:[#allocation6 + $0x268] sm:$0xff]  ;;  %v2643_v24 = vpack.c.bf16 %v683_v12, %v682_v11  ;;  %v652_v27 = vld [vmem:[#allocation6 + $0x2f0] sm:$0xff] }
  0x5c   :  { %485 = vmatprep.mubr.f32.mxu1 %v2979_v52  ;;  %2606 = vmatpush3.bf16.msra.mxu0 %v2605_v61  ;;  %v634_v19 = vld [vmem:[#allocation6 + $0x260] sm:$0xff]  ;;  %v667_v25 = vld [vmem:[#allocation6 + $0x368] sm:$0xff]  ;;  %v653_v29 = vld [vmem:[#allocation6 + $0x2f8] sm:$0xff] }
  0x5d   :  { %2638 = vmatpush3.bf16.msra.mxu1 %v2637_v63  ;;  %2608 = vmatprep.subr.bf16.mxu0 %v2607_v1  ;;  %v666_v21 = vld [vmem:[#allocation6 + $0x360] sm:$0xff]  ;;  %v684_v30 = vld [vmem:[#allocation6 + $0x3f0] sm:$0xff]  ;;  %v685_v31 = vld [vmem:[#allocation6 + $0x3f8] sm:$0xff]  ;;  %v2613_v34 = vpack.c.bf16 %v635_v20, %v634_v19  ;;  %v2615_v36 = vpack.c.bf16 %v653_v29, %v652_v27 }
  0x5e   :  { %341 = vmatmul.mubr.f32.gmra.mrb[10].mxu0 %v153_v60  ;;  %2640 = vmatprep.subr.bf16.mxu1 %v2639_v6  ;;  %v155_v32 = vld [vmem:[#allocation2 + $0x70] sm:$0xff]  ;;  %v2645_v35 = vpack.c.bf16 %v667_v25, %v666_v21  ;;  %v637_v38 = vld [vmem:[#allocation6 + $0x278] sm:$0xff]  ;;  %v2647_v42 = vpack.c.bf16 %v685_v31, %v684_v30  ;;  %v1074_v45 = vld [vmem:[#allocation6 + $0x480] sm:$0xff] }
  0x5f   :  { %486 = vmatmul.mubr.f32.gmra.mrb[10].mxu1 %v154_v15  ;;  %345 = vmatprep.mubr.f32.mxu0 %v2979_v52  ;;  %v636_v37 = vld [vmem:[#allocation6 + $0x270] sm:$0xff]  ;;  %v669_v43 = vld [vmem:[#allocation6 + $0x378] sm:$0xff]  ;;  %v1075_v47 = vld [vmem:[#allocation6 + $0x488] sm:$0xff] }
  0x60   :  { %490 = vmatprep.mubr.f32.mxu1 %v2982_v59  ;;  %2610 = vmatpush3.bf16.msra.mxu0 %v2609_v16  ;;  %v668_v39 = vld [vmem:[#allocation6 + $0x370] sm:$0xff]  ;;  %v1106_v48 = vld [vmem:[#allocation6 + $0x580] sm:$0xff]  ;;  %v1107_v49 = vld [vmem:[#allocation6 + $0x588] sm:$0xff]  ;;  %v2617_v53 = vpack.c.bf16 %v637_v38, %v636_v37  ;;  %v2651_v55 = vpack.c.bf16 %v1075_v47, %v1074_v45 }
  0x61   :  { %2642 = vmatpush3.bf16.msra.mxu1 %v2641_v17  ;;  %2612 = vmatprep.subr.bf16.mxu0 %v2611_v18  ;;  %v3027_v50 = vld [vmem:[#allocation2 + $0x80] sm:$0xff]  ;;  %v2649_v54 = vpack.c.bf16 %v669_v43, %v668_v39  ;;  %v2683_v56 = vpack.c.bf16 %v1107_v49, %v1106_v48  ;;  %v157_v57 = vld [vmem:[#allocation2 + $0xb0] sm:$0xff]  ;;  %v1059_v7 = vld [vmem:[#allocation6 + $0x408] sm:$0xff] }
  0x62   :  { %346 = vmatmul.mubr.f32.gmra.mrb[12].mxu0 %v154_v15  ;;  %2644 = vmatprep.subr.bf16.mxu1 %v2643_v24  ;;  %v3029_v51 = vld [vmem:[#allocation2 + $0xa1] sm:$0xff]  ;;  %v3042_v61 = vld [vmem:[#allocation2 + $0xd0] sm:$0xff]  ;;  %v1077_v15 = vld [vmem:[#allocation6 + $0x498] sm:$0xff] }
  0x63   :  { %491 = vmatmul.mubr.f32.gmra.mrb[12].mxu1 %v155_v32  ;;  %350 = vmatprep.mubr.f32.mxu0 %v2982_v59  ;;  %v3037_v60 = vld [vmem:[#allocation2 + $0xc0] sm:$0xff]  ;;  %v3054_v63 = vld [vmem:[#allocation2 + $0xf0] sm:$0xff]  ;;  %v1091_v11 = vld [vmem:[#allocation6 + $0x508] sm:$0xff] }
  0x64   :  { %495 = vmatprep.mubr.f32.mxu1 %v2986_v4  ;;  %2614 = vmatpush3.bf16.msra.mxu0 %v2613_v34  ;;  %v3060_v1 = vld [vmem:[#allocation2 + $0x100] sm:$0xff]  ;;  %v3066_v2 = vld [vmem:[#allocation2 + $0x110] sm:$0xff]  ;;  %v1109_v18 = vld [vmem:[#allocation6 + $0x598] sm:$0xff] }
  0x65   :  { %2646 = vmatpush3.bf16.msra.mxu1 %v2645_v35  ;;  %2616 = vmatprep.subr.bf16.mxu0 %v2615_v36  ;;  %v573_v3 = vld [vmem:[#allocation2 + $0x2] sm:$0xff]  ;;  %v3074_v8 = vld [vmem:[#allocation2 + $0x12] sm:$0xff] }
  0x66   :  { %351 = vmatmul.mubr.f32.gmra.mrb[14].mxu0 %v155_v32  ;;  %2648 = vmatprep.subr.bf16.mxu1 %v2647_v42  ;;  %v3072_v5 = vld [vmem:[#allocation2 + $0x120] sm:$0xff]  ;;  %v1076_v12 = vld [vmem:[#allocation6 + $0x490] sm:$0xff]  ;;  %v1061_v25 = vld [vmem:[#allocation6 + $0x418] sm:$0xff] }
  0x67   :  { %496 = vmatmul.mubr.f32.gmra.mrb[14].mxu1 %v3027_v50  ;;  %355 = vmatprep.mubr.f32.mxu0 %v3029_v51  ;;  %v1058_v6 = vld [vmem:[#allocation6 + $0x400] sm:$0xff]  ;;  %v1108_v17 = vld [vmem:[#allocation6 + $0x590] sm:$0xff]  ;;  %v2655_v21 = vpack.c.bf16 %v1077_v15, %v1076_v12  ;;  %v1093_v30 = vld [vmem:[#allocation6 + $0x518] sm:$0xff] }
  0x68   :  { %500 = vmatprep.mubr.f32.mxu1 %v2990_v9  ;;  %2618 = vmatpush3.bf16.msra.mxu0 %v2617_v53  ;;  %v1090_v10 = vld [vmem:[#allocation6 + $0x500] sm:$0xff]  ;;  %v2653_v16 = vpack.c.bf16 %v1059_v7, %v1058_v6  ;;  %v1060_v24 = vld [vmem:[#allocation6 + $0x410] sm:$0xff]  ;;  %v2687_v29 = vpack.c.bf16 %v1109_v18, %v1108_v17  ;;  %v1079_v32 = vld [vmem:[#allocation6 + $0x4a8] sm:$0xff] }
  0x69   :  { %2650 = vmatpush3.bf16.msra.mxu1 %v2649_v54  ;;  %2652 = vmatprep.subr.bf16.mxu0 %v2651_v55  ;;  %v2685_v19 = vpack.c.bf16 %v1091_v11, %v1090_v10  ;;  %v3079_v20 = vld [vmem:[#allocation2 + $0x22] sm:$0xff]  ;;  %v1092_v27 = vld [vmem:[#allocation6 + $0x510] sm:$0xff]  ;;  %v2657_v37 = vpack.c.bf16 %v1061_v25, %v1060_v24  ;;  %v1081_v49 = vld [vmem:[#allocation6 + $0x4b8] sm:$0xff] }
  0x6a   :  { %356 = vmatmul.mubr.f32.gmra.mrb[16].mxu0 %v2872_v0  ;;  %2684 = vmatprep.subr.bf16.mxu1 %v2683_v56  ;;  %v3048_v0 = vld [vmem:[#allocation2 + $0xe0] sm:$0xff]  ;;  %v1111_v35 = vld [vmem:[#allocation6 + $0x5a8] sm:$0xff]  ;;  %v3084_v36 = vld [vmem:[#allocation2 + $0x32] sm:$0xff]  ;;  %v2689_v38 = vpack.c.bf16 %v1093_v30, %v1092_v27 }
  0x6b   :  { %501 = vmatmul.mubr.f32.gmra.mrb[16].mxu1 %v157_v57  ;;  %360 = vmatprep.mubr.f32.mxu0 %v2990_v9  ;;  %v1078_v31 = vld [vmem:[#allocation6 + $0x4a0] sm:$0xff]  ;;  %v1063_v42 = vld [vmem:[#allocation6 + $0x428] sm:$0xff]  ;;  %v1080_v48 = vld [vmem:[#allocation6 + $0x4b0] sm:$0xff] }
  0x6c   :  { %505 = vmatprep.mubr.f32.mxu1 %v2995_v22  ;;  %v1110_v34 = vld [vmem:[#allocation6 + $0x5a0] sm:$0xff]  ;;  %v1095_v47 = vld [vmem:[#allocation6 + $0x528] sm:$0xff]  ;;  %v1112_v53 = vld [vmem:[#allocation6 + $0x5b0] sm:$0xff] }
  0x6d   :  { %v1062_v39 = vld [vmem:[#allocation6 + $0x420] sm:$0xff]  ;;  %v2691_v45 = vpack.c.bf16 %v1111_v35, %v1110_v34  ;;  %v1113_v54 = vld [vmem:[#allocation6 + $0x5b8] sm:$0xff]  ;;  %v1096_v7 = vld [vmem:[#allocation6 + $0x530] sm:$0xff] }
  0x6e   :  { %361 = vmatmul.mubr.f32.gmra.mrb[18].mxu0 %v157_v57  ;;  %v1094_v43 = vld [vmem:[#allocation6 + $0x520] sm:$0xff]  ;;  %v2661_v56 = vpack.c.bf16 %v1063_v42, %v1062_v39  ;;  %v2663_v57 = vpack.c.bf16 %v1081_v49, %v1080_v48  ;;  %v1065_v6 = vld [vmem:[#allocation6 + $0x438] sm:$0xff]  ;;  %v2695_v10 = vpack.c.bf16 %v1113_v54, %v1112_v53  ;;  %v1083_v15 = vld [vmem:[#allocation6 + $0x4c8] sm:$0xff] }
  0x6f   :  { %506 = vmatmul.mubr.f32.gmra.mrb[18].mxu1 %v3037_v60  ;;  %365 = vmatprep.mubr.f32.mxu0 %v2995_v22  ;;  %v3091_v55 = vld [vmem:[#allocation2 + $0x42] sm:$0xff]  ;;  %v1097_v11 = vld [vmem:[#allocation6 + $0x538] sm:$0xff]  ;;  %v1116_v34 = vld [vmem:[#allocation6 + $0x5d0] sm:$0xff] }
  0x70   :  { %510 = vmatprep.mubr.f32.mxu1 %v2999_v26  ;;  %v1082_v12 = vld [vmem:[#allocation6 + $0x4c0] sm:$0xff]  ;;  %v1115_v17 = vld [vmem:[#allocation6 + $0x5c8] sm:$0xff]  ;;  %v3097_v18 = vld [vmem:[#allocation2 + $0x52] sm:$0xff] }
  0x71   :  { %v1066_v24 = vld [vmem:[#allocation6 + $0x440] sm:$0xff]  ;;  %v1067_v25 = vld [vmem:[#allocation6 + $0x448] sm:$0xff]  ;;  %v1117_v35 = vld [vmem:[#allocation6 + $0x5d8] sm:$0xff] }
  0x72   :  { %366 = vmatmul.mubr.f32.gmra.mrb[20].mxu0 %v3037_v60  ;;  %v1098_v27 = vld [vmem:[#allocation6 + $0x540] sm:$0xff]  ;;  %v1099_v30 = vld [vmem:[#allocation6 + $0x548] sm:$0xff]  ;;  %v1068_v39 = vld [vmem:[#allocation6 + $0x450] sm:$0xff] }
  0x73   :  { %511 = vmatmul.mubr.f32.gmra.mrb[20].mxu1 %v3042_v61  ;;  %370 = vmatprep.mubr.f32.mxu0 %v2999_v26  ;;  %v1069_v42 = vld [vmem:[#allocation6 + $0x458] sm:$0xff]  ;;  %v1086_v48 = vld [vmem:[#allocation6 + $0x4e0] sm:$0xff]  ;;  %v1087_v49 = vld [vmem:[#allocation6 + $0x4e8] sm:$0xff] }
  0x74   :  { %515 = vmatprep.mubr.f32.mxu1 %v3003_v40  ;;  %v1118_v53 = vld [vmem:[#allocation6 + $0x5e0] sm:$0xff]  ;;  %v1119_v54 = vld [vmem:[#allocation6 + $0x5e8] sm:$0xff] }
  0x76   :  { %371 = vmatmul.mubr.f32.gmra.mrb[22].mxu0 %v3042_v61 }
  0x77   :  { %516 = vmatmul.mubr.f32.gmra.mrb[22].mxu1 %v3048_v0  ;;  %375 = vmatprep.mubr.f32.mxu0 %v3003_v40 }
  0x78   :  { %520 = vmatprep.mubr.f32.mxu1 %v3007_v44 }
  0x7a   :  { %376 = vmatmul.mubr.f32.gmra.mrb[24].mxu0 %v3048_v0 }
  0x7b   :  { %521 = vmatmul.mubr.f32.gmra.mrb[24].mxu1 %v3054_v63  ;;  %380 = vmatprep.mubr.f32.mxu0 %v3007_v44 }
  0x7c   :  { %525 = vmatprep.mubr.f32.mxu1 %v3011_v58 }
  0x7e   :  { %381 = vmatmul.mubr.f32.gmra.mrb[26].mxu0 %v3054_v63 }
  0x7f   :  { %526 = vmatmul.mubr.f32.gmra.mrb[26].mxu1 %v3060_v1  ;;  %385 = vmatprep.mubr.f32.mxu0 %v3011_v58 }
  0x80   :  { %530 = vmatprep.mubr.f32.mxu1 %v3015_v62 }
  0x82   :  { %386 = vmatmul.mubr.f32.gmra.mrb[28].mxu0 %v3060_v1 }
  0x83   :  { %531 = vmatmul.mubr.f32.gmra.mrb[28].mxu1 %v3066_v2  ;;  %390 = vmatprep.mubr.f32.mxu0 %v3015_v62 }
  0x84   :  { %535 = vmatprep.mubr.f32.mxu1 %v3019_v13 }
  0x86   :  { %391 = vmatmul.mubr.f32.gmra.mrb[30].mxu0 %v3066_v2 }
  0x87   :  { %536 = vmatmul.mubr.f32.gmra.mrb[30].mxu1 %v3072_v5  ;;  %750 = vmatprep.mubr.f32.mxu0 %v573_v3  ;;  %v1064_v3 = vld [vmem:[#allocation6 + $0x430] sm:$0xff] }
  0x88   :  { %895 = vmatprep.mubr.f32.mxu1 %v3074_v8 }
  0x8a   :  { %751 = vmatmul.mubr.f32.vlgmr.msra.gmra.mrb[32].mxu0 %v2960_v14  ;;  %v2659_v14 = vpack.c.bf16 %v1079_v32, %v1078_v31  ;;  %v1084_v31 = vld [vmem:[#allocation6 + $0x4d0] sm:$0xff]  ;;  %v1085_v32 = vld [vmem:[#allocation6 + $0x4d8] sm:$0xff] }
  0x8b   :  { %2654 = vmatpush3.bf16.msra.mxu0 %v2653_v16  ;;  %896 = vmatmul.mubr.f32.vlgmr.msra.gmra.mrb[32].mxu1 %v2963_v23  ;;  %v1114_v16 = vld [vmem:[#allocation6 + $0x5c0] sm:$0xff] }
  0x8c   :  { %755 = vmatprep.mubr.f32.mxu0 %v3074_v8  ;;  %2686 = vmatpush3.bf16.msra.mxu1 %v2685_v19  ;;  %v2665_v19 = vpack.c.bf16 %v1065_v6, %v1064_v3  ;;  %v1070_v3 = vld [vmem:[#allocation6 + $0x460] sm:$0xff]  ;;  %v1071_v6 = vld [vmem:[#allocation6 + $0x468] sm:$0xff] }
  0x8d   :  { %900 = vmatprep.mubr.f32.mxu1 %v3079_v20  ;;  %2656 = vmatprep.subr.bf16.mxu0 %v2655_v21  ;;  %v2667_v21 = vpack.c.bf16 %v1083_v15, %v1082_v12  ;;  %v1088_v12 = vld [vmem:[#allocation6 + $0x4f0] sm:$0xff]  ;;  %v1089_v15 = vld [vmem:[#allocation6 + $0x4f8] sm:$0xff] }
  0x8e   :  { %756 = vmatmul.mubr.f32.gmra.mrb[34].mxu0 %v2963_v23  ;;  %2688 = vmatprep.subr.bf16.mxu1 %v2687_v29  ;;  %v2693_v23 = vpack.c.bf16 %v1095_v47, %v1094_v43  ;;  %v2699_v29 = vpack.c.bf16 %v1115_v17, %v1114_v16  ;;  %v1100_v43 = vld [vmem:[#allocation6 + $0x550] sm:$0xff]  ;;  %v1101_v47 = vld [vmem:[#allocation6 + $0x558] sm:$0xff] }
  0x8f   :  { %901 = vmatmul.mubr.f32.gmra.mrb[34].mxu1 %v2967_v28  ;;  %760 = vmatprep.mubr.f32.mxu0 %v3079_v20  ;;  %v1120_v16 = vld [vmem:[#allocation6 + $0x5f0] sm:$0xff]  ;;  %v1121_v17 = vld [vmem:[#allocation6 + $0x5f8] sm:$0xff] }
  0x90   :  { %905 = vmatprep.mubr.f32.mxu1 %v3084_v36  ;;  %2658 = vmatpush3.bf16.msra.mxu0 %v2657_v37  ;;  %v3103_v37 = vld [vmem:[#allocation2 + $0x62] sm:$0xff] }
  0x91   :  { %2690 = vmatpush3.bf16.msra.mxu1 %v2689_v38  ;;  %2660 = vmatprep.subr.bf16.mxu0 %v2659_v14  ;;  %v2669_v38 = vpack.c.bf16 %v1067_v25, %v1066_v24  ;;  %v2671_v14 = vpack.c.bf16 %v1085_v32, %v1084_v31  ;;  %v1072_v24 = vld [vmem:[#allocation6 + $0x470] sm:$0xff]  ;;  %v1073_v25 = vld [vmem:[#allocation6 + $0x478] sm:$0xff]  ;;  %v1510_v31 = vld [vmem:[#allocation6 + $0x680] sm:$0xff] }
  0x92   :  { %761 = vmatmul.mubr.f32.gmra.mrb[36].mxu0 %v2967_v28  ;;  %2692 = vmatprep.subr.bf16.mxu1 %v2691_v45  ;;  %v2697_v28 = vpack.c.bf16 %v1097_v11, %v1096_v7  ;;  %v2703_v45 = vpack.c.bf16 %v1117_v35, %v1116_v34  ;;  %v1102_v7 = vld [vmem:[#allocation6 + $0x560] sm:$0xff]  ;;  %v1103_v11 = vld [vmem:[#allocation6 + $0x568] sm:$0xff] }
  0x93   :  { %906 = vmatmul.mubr.f32.gmra.mrb[36].mxu1 %v2970_v33  ;;  %765 = vmatprep.mubr.f32.mxu0 %v3084_v36  ;;  %v1511_v32 = vld [vmem:[#allocation6 + $0x688] sm:$0xff]  ;;  %v1542_v34 = vld [vmem:[#allocation6 + $0x780] sm:$0xff] }
  0x94   :  { %910 = vmatprep.mubr.f32.mxu1 %v3091_v55  ;;  %2662 = vmatpush3.bf16.msra.mxu0 %v2661_v56  ;;  %v3109_v56 = vld [vmem:[#allocation2 + $0x72] sm:$0xff]  ;;  %v1543_v35 = vld [vmem:[#allocation6 + $0x788] sm:$0xff] }
  0x95   :  { %2694 = vmatpush3.bf16.msra.mxu1 %v2693_v23  ;;  %2664 = vmatprep.subr.bf16.mxu0 %v2663_v57  ;;  %v2673_v23 = vpack.c.bf16 %v1069_v42, %v1068_v39  ;;  %v2675_v57 = vpack.c.bf16 %v1087_v49, %v1086_v48  ;;  %v2715_v39 = vpack.c.bf16 %v1511_v32, %v1510_v31  ;;  %v1526_v48 = vld [vmem:[#allocation6 + $0x700] sm:$0xff]  ;;  %v1527_v49 = vld [vmem:[#allocation6 + $0x708] sm:$0xff] }
  0x96   :  { %766 = vmatmul.mubr.f32.gmra.mrb[38].mxu0 %v2970_v33  ;;  %2696 = vmatprep.subr.bf16.mxu1 %v2695_v10  ;;  %v2701_v33 = vpack.c.bf16 %v1099_v30, %v1098_v27  ;;  %v2707_v10 = vpack.c.bf16 %v1119_v54, %v1118_v53  ;;  %v1104_v27 = vld [vmem:[#allocation6 + $0x570] sm:$0xff]  ;;  %v1105_v30 = vld [vmem:[#allocation6 + $0x578] sm:$0xff]  ;;  %v2747_v42 = vpack.c.bf16 %v1543_v35, %v1542_v34  ;;  %v1498_v31 = vld [vmem:[#allocation6 + $0x620] sm:$0xff] }
  0x97   :  { %911 = vmatmul.mubr.f32.gmra.mrb[38].mxu1 %v2973_v41  ;;  %770 = vmatprep.mubr.f32.mxu0 %v3091_v55  ;;  %v1512_v53 = vld [vmem:[#allocation6 + $0x690] sm:$0xff]  ;;  %v1513_v54 = vld [vmem:[#allocation6 + $0x698] sm:$0xff]  ;;  %v1499_v32 = vld [vmem:[#allocation6 + $0x628] sm:$0xff] }
  0x98   :  { %915 = vmatprep.mubr.f32.mxu1 %v3097_v18  ;;  %2666 = vmatpush3.bf16.msra.mxu0 %v2665_v19  ;;  %v3115_v19 = vld [vmem:[#allocation2 + $0x82] sm:$0xff] }
  0x99   :  { %2698 = vmatpush3.bf16.msra.mxu1 %v2697_v28  ;;  %2668 = vmatprep.subr.bf16.mxu0 %v2667_v21  ;;  %v2677_v28 = vpack.c.bf16 %v1071_v6, %v1070_v3  ;;  %v2679_v21 = vpack.c.bf16 %v1089_v15, %v1088_v12  ;;  %v1025_v3 = vld [vmem:[#allocation2 + $0x20] sm:$0xff]  ;;  %v2749_v6 = vpack.c.bf16 %v1527_v49, %v1526_v48  ;;  %v1497_v12 = vld [vmem:[#allocation6 + $0x618] sm:$0xff] }
  0x9a   :  { %771 = vmatmul.mubr.f32.gmra.mrb[40].mxu0 %v2973_v41  ;;  %2700 = vmatprep.subr.bf16.mxu1 %v2699_v29  ;;  %v2705_v41 = vpack.c.bf16 %v1101_v47, %v1100_v43  ;;  %v2711_v29 = vpack.c.bf16 %v1121_v17, %v1120_v16  ;;  %v3126_v43 = vld [vmem:[#allocation2 + $0xc2] sm:$0xff]  ;;  %v1529_v16 = vld [vmem:[#allocation6 + $0x718] sm:$0xff]  ;;  %v2725_v48 = vpack.c.bf16 %v1499_v32, %v1498_v31  ;;  %v1552_v31 = vld [vmem:[#allocation6 + $0x7d0] sm:$0xff] }
  0x9b   :  { %916 = vmatmul.mubr.f32.gmra.mrb[40].mxu1 %v2976_v46  ;;  %775 = vmatprep.mubr.f32.mxu0 %v3097_v18  ;;  %v3170_v47 = vld [vmem:[#allocation2 + $0x21] sm:$0xff]  ;;  %v1553_v32 = vld [vmem:[#allocation6 + $0x7d8] sm:$0xff] }
  0x9c   :  { %920 = vmatprep.mubr.f32.mxu1 %v3103_v37  ;;  %2670 = vmatpush3.bf16.msra.mxu0 %v2669_v38  ;;  %v581_v38 = vld [vmem:[#allocation2 + $0xa2] sm:$0xff] }
  0x9d   :  { %2702 = vmatpush3.bf16.msra.mxu1 %v2701_v33  ;;  %2672 = vmatprep.subr.bf16.mxu0 %v2671_v14  ;;  %v2681_v33 = vpack.c.bf16 %v1073_v25, %v1072_v24  ;;  %v3121_v14 = vld [vmem:[#allocation2 + $0xb2] sm:$0xff]  ;;  %v1514_v17 = vld [vmem:[#allocation6 + $0x6a0] sm:$0xff] }
  0x9e   :  { %776 = vmatmul.mubr.f32.gmra.mrb[42].mxu0 %v2976_v46  ;;  %2704 = vmatprep.subr.bf16.mxu1 %v2703_v45  ;;  %v2709_v46 = vpack.c.bf16 %v1103_v11, %v1102_v7  ;;  %v1494_v45 = vld [vmem:[#allocation6 + $0x600] sm:$0xff]  ;;  %v3176_v7 = vld [vmem:[#allocation2 + $0x31] sm:$0xff] }
  0x9f   :  { %921 = vmatmul.mubr.f32.gmra.mrb[42].mxu1 %v2979_v52  ;;  %780 = vmatprep.mubr.f32.mxu0 %v3103_v37  ;;  %v1496_v11 = vld [vmem:[#allocation6 + $0x610] sm:$0xff]  ;;  %v3179_v25 = vld [vmem:[#allocation2 + $0x41] sm:$0xff] }
  0xa0   :  { %925 = vmatprep.mubr.f32.mxu1 %v3109_v56  ;;  %2674 = vmatpush3.bf16.msra.mxu0 %v2673_v23  ;;  %v1026_v24 = vld [vmem:[#allocation2 + $0x30] sm:$0xff]  ;;  %v1530_v34 = vld [vmem:[#allocation6 + $0x720] sm:$0xff] }
  0xa1   :  { %2706 = vmatpush3.bf16.msra.mxu1 %v2705_v41  ;;  %2676 = vmatprep.subr.bf16.mxu0 %v2675_v57  ;;  %v1544_v41 = vld [vmem:[#allocation6 + $0x790] sm:$0xff]  ;;  %v1545_v57 = vld [vmem:[#allocation6 + $0x798] sm:$0xff] }
  0xa2   :  { %781 = vmatmul.mubr.f32.gmra.mrb[44].mxu0 %v2979_v52  ;;  %2708 = vmatprep.subr.bf16.mxu1 %v2707_v10  ;;  %v2713_v52 = vpack.c.bf16 %v1105_v30, %v1104_v27  ;;  %v2719_v10 = vpack.c.bf16 %v1513_v54, %v1512_v53  ;;  %v2751_v15 = vpack.c.bf16 %v1545_v57, %v1544_v41  ;;  %v1500_v54 = vld [vmem:[#allocation6 + $0x630] sm:$0xff]  ;;  %v1533_v57 = vld [vmem:[#allocation6 + $0x738] sm:$0xff] }
  0xa3   :  { %926 = vmatmul.mubr.f32.gmra.mrb[44].mxu1 %v2982_v59  ;;  %785 = vmatprep.mubr.f32.mxu0 %v3109_v56  ;;  %v2721_v27 = vpack.c.bf16 %v1497_v12, %v1496_v11  ;;  %v1551_v11 = vld [vmem:[#allocation6 + $0x7c8] sm:$0xff]  ;;  %v1028_v12 = vld [vmem:[#allocation2 + $0x50] sm:$0xff] }
  0xa4   :  { %930 = vmatprep.mubr.f32.mxu1 %v3115_v19  ;;  %2678 = vmatpush3.bf16.msra.mxu0 %v2677_v28  ;;  %v1515_v28 = vld [vmem:[#allocation6 + $0x6a8] sm:$0xff] }
  0xa5   :  { %2710 = vmatpush3.bf16.msra.mxu1 %v2709_v46  ;;  %2680 = vmatprep.subr.bf16.mxu0 %v2679_v21  ;;  %v1546_v46 = vld [vmem:[#allocation6 + $0x7a0] sm:$0xff]  ;;  %v1547_v21 = vld [vmem:[#allocation6 + $0x7a8] sm:$0xff]  ;;  %v2723_v30 = vpack.c.bf16 %v1515_v28, %v1514_v17 }
  0xa6   :  { %786 = vmatmul.mubr.f32.gmra.mrb[46].mxu0 %v2982_v59  ;;  %2712 = vmatprep.subr.bf16.mxu1 %v2711_v29  ;;  %v3132_v59 = vld [vmem:[#allocation2 + $0xd2] sm:$0xff]  ;;  %v2755_v35 = vpack.c.bf16 %v1547_v21, %v1546_v46  ;;  %v1502_v28 = vld [vmem:[#allocation6 + $0x640] sm:$0xff]  ;;  %v1503_v46 = vld [vmem:[#allocation6 + $0x648] sm:$0xff] }
  0xa7   :  { %931 = vmatmul.mubr.f32.gmra.mrb[46].mxu1 %v2986_v4  ;;  %790 = vmatprep.mubr.f32.mxu0 %v581_v38  ;;  %v3138_v4 = vld [vmem:[#allocation2 + $0xe2] sm:$0xff] }
  0xa8   :  { %935 = vmatprep.mubr.f32.mxu1 %v3121_v14  ;;  %2682 = vmatpush3.bf16.msra.mxu0 %v2681_v33  ;;  %v1531_v38 = vld [vmem:[#allocation6 + $0x728] sm:$0xff]  ;;  %v1516_v33 = vld [vmem:[#allocation6 + $0x6b0] sm:$0xff]  ;;  %v1534_v21 = vld [vmem:[#allocation6 + $0x740] sm:$0xff] }
  0xa9   :  { %2714 = vmatpush3.bf16.msra.mxu1 %v2713_v52  ;;  %2716 = vmatprep.subr.bf16.mxu0 %v2715_v39  ;;  %v1517_v52 = vld [vmem:[#allocation6 + $0x6b8] sm:$0xff]  ;;  %v1548_v39 = vld [vmem:[#allocation6 + $0x7b0] sm:$0xff]  ;;  %v2757_v49 = vpack.c.bf16 %v1531_v38, %v1530_v34  ;;  %v1029_v34 = vld [vmem:[#allocation2 + $0x60] sm:$0xff]  ;;  %v2733_v38 = vpack.c.bf16 %v1503_v46, %v1502_v28 }
  0xaa   :  { %791 = vmatmul.mubr.f32.gmra.mrb[48].mxu0 %v3029_v51  ;;  %2748 = vmatprep.subr.bf16.mxu1 %v2747_v42  ;;  %v3144_v51 = vld [vmem:[#allocation2 + $0xf2] sm:$0xff]  ;;  %v2727_v53 = vpack.c.bf16 %v1517_v52, %v1516_v33 }
  0xab   :  { %936 = vmatmul.mubr.f32.gmra.mrb[48].mxu1 %v2990_v9  ;;  %795 = vmatprep.mubr.f32.mxu0 %v3121_v14  ;;  %v1549_v42 = vld [vmem:[#allocation6 + $0x7b8] sm:$0xff]  ;;  %v1556_v46 = vld [vmem:[#allocation6 + $0x7f0] sm:$0xff] }
  0xac   :  { %940 = vmatprep.mubr.f32.mxu1 %v3126_v43  ;;  %v2759_v41 = vpack.c.bf16 %v1549_v42, %v1548_v39  ;;  %v1504_v39 = vld [vmem:[#allocation6 + $0x650] sm:$0xff]  ;;  %v1505_v42 = vld [vmem:[#allocation6 + $0x658] sm:$0xff] }
  0xad   :  { %v1525_v28 = vld [vmem:[#allocation6 + $0x6f8] sm:$0xff] }
  0xae   :  { %796 = vmatmul.mubr.f32.gmra.mrb[50].mxu0 %v2990_v9  ;;  %v3150_v9 = vld [vmem:[#allocation2 + $0x102] sm:$0xff] }
  0xaf   :  { %941 = vmatmul.mubr.f32.gmra.mrb[50].mxu1 %v2995_v22  ;;  %800 = vmatprep.mubr.f32.mxu0 %v3126_v43 }
  0xb0   :  { %945 = vmatprep.mubr.f32.mxu1 %v3132_v59 }
  0xb2   :  { %801 = vmatmul.mubr.f32.gmra.mrb[52].mxu0 %v2995_v22  ;;  %v3156_v22 = vld [vmem:[#allocation2 + $0x112] sm:$0xff] }
  0xb3   :  { %946 = vmatmul.mubr.f32.gmra.mrb[52].mxu1 %v2999_v26  ;;  %805 = vmatprep.mubr.f32.mxu0 %v3132_v59 }
  0xb4   :  { %950 = vmatprep.mubr.f32.mxu1 %v3138_v4 }
  0xb6   :  { %806 = vmatmul.mubr.f32.gmra.mrb[54].mxu0 %v2999_v26  ;;  %v3162_v26 = vld [vmem:[#allocation2 + $0x122] sm:$0xff] }
  0xb7   :  { %951 = vmatmul.mubr.f32.gmra.mrb[54].mxu1 %v3003_v40  ;;  %810 = vmatprep.mubr.f32.mxu0 %v3138_v4 }
  0xb8   :  { %955 = vmatprep.mubr.f32.mxu1 %v3144_v51 }
  0xba   :  { %811 = vmatmul.mubr.f32.gmra.mrb[56].mxu0 %v3003_v40  ;;  %v3168_v40 = vld [vmem:[#allocation2 + $0x11] sm:$0xff] }
  0xbb   :  { %956 = vmatmul.mubr.f32.gmra.mrb[56].mxu1 %v3007_v44  ;;  %815 = vmatprep.mubr.f32.mxu0 %v3144_v51 }
  0xbc   :  { %960 = vmatprep.mubr.f32.mxu1 %v3150_v9 }
  0xbe   :  { %816 = vmatmul.mubr.f32.gmra.mrb[58].mxu0 %v3007_v44  ;;  %v1495_v44 = vld [vmem:[#allocation6 + $0x608] sm:$0xff] }
  0xbf   :  { %961 = vmatmul.mubr.f32.gmra.mrb[58].mxu1 %v3011_v58  ;;  %820 = vmatprep.mubr.f32.mxu0 %v3150_v9  ;;  %v2717_v23 = vpack.c.bf16 %v1495_v44, %v1494_v45  ;;  %v1027_v45 = vld [vmem:[#allocation2 + $0x40] sm:$0xff]  ;;  %v3184_v44 = vld [vmem:[#allocation2 + $0x51] sm:$0xff] }
  0xc0   :  { %965 = vmatprep.mubr.f32.mxu1 %v3156_v22 }
  0xc2   :  { %821 = vmatmul.mubr.f32.gmra.mrb[60].mxu0 %v3011_v58  ;;  %v992_v58 = vld [vmem:[#allocation2 + $0x10] sm:$0xff] }
  0xc3   :  { %966 = vmatmul.mubr.f32.gmra.mrb[60].mxu1 %v3015_v62  ;;  %825 = vmatprep.mubr.f32.mxu0 %v3156_v22 }
  0xc4   :  { %970 = vmatprep.mubr.f32.mxu1 %v3162_v26 }
  0xc6   :  { %826 = vmatmul.mubr.f32.gmra.mrb[62].mxu0 %v3015_v62  ;;  %v1528_v62 = vld [vmem:[#allocation6 + $0x710] sm:$0xff] }
  0xc7   :  { %971 = vmatmul.mubr.f32.gmra.mrb[62].mxu1 %v3019_v13  ;;  %1186 = vmatprep.mubr.f32.mxu0 %v3168_v40  ;;  %v2753_v29 = vpack.c.bf16 %v1529_v16, %v1528_v62  ;;  %v3188_v62 = vld [vmem:[#allocation2 + $0x61] sm:$0xff] }
  0xc8   :  { %1331 = vmatprep.mubr.f32.mxu1 %v3170_v47 }
  0xca   :  { %1187 = vmatmul.mubr.f32.vlgmr.msra.gmra.mrb[64].mxu0 %v992_v58  ;;  %v1501_v58 = vld [vmem:[#allocation6 + $0x638] sm:$0xff] }
  0xcb   :  { %2718 = vmatpush3.bf16.msra.mxu0 %v2717_v23  ;;  %1332 = vmatmul.mubr.f32.vlgmr.msra.gmra.mrb[64].mxu1 %v1025_v3  ;;  %v1532_v23 = vld [vmem:[#allocation6 + $0x730] sm:$0xff] }
  0xcc   :  { %1191 = vmatprep.mubr.f32.mxu0 %v3170_v47  ;;  %2750 = vmatpush3.bf16.msra.mxu1 %v2749_v6  ;;  %v1519_v6 = vld [vmem:[#allocation6 + $0x6c8] sm:$0xff]  ;;  %v2761_v16 = vpack.c.bf16 %v1533_v57, %v1532_v23  ;;  %v2737_v57 = vpack.c.bf16 %v1505_v42, %v1504_v39  ;;  %v1541_v39 = vld [vmem:[#allocation6 + $0x778] sm:$0xff]  ;;  %v999_v42 = vld [vmem:[#allocation2 + $0x80] sm:$0xff] }
  0xcd   :  { %1336 = vmatprep.mubr.f32.mxu1 %v3176_v7  ;;  %2720 = vmatprep.subr.bf16.mxu0 %v2719_v10  ;;  %v1550_v10 = vld [vmem:[#allocation6 + $0x7c0] sm:$0xff]  ;;  %v1555_v23 = vld [vmem:[#allocation6 + $0x7e8] sm:$0xff] }
  0xce   :  { %1192 = vmatmul.mubr.f32.gmra.mrb[66].mxu0 %v1025_v3  ;;  %2752 = vmatprep.subr.bf16.mxu1 %v2751_v15  ;;  %v1518_v3 = vld [vmem:[#allocation6 + $0x6c0] sm:$0xff]  ;;  %v2729_v15 = vpack.c.bf16 %v1501_v58, %v1500_v54  ;;  %v1523_v54 = vld [vmem:[#allocation6 + $0x6e8] sm:$0xff] }
  0xcf   :  { %1337 = vmatmul.mubr.f32.gmra.mrb[66].mxu1 %v1026_v24  ;;  %1196 = vmatprep.mubr.f32.mxu0 %v3176_v7  ;;  %v2731_v17 = vpack.c.bf16 %v1519_v6, %v1518_v3  ;;  %v1554_v58 = vld [vmem:[#allocation6 + $0x7e0] sm:$0xff] }
  0xd0   :  { %1341 = vmatprep.mubr.f32.mxu1 %v3179_v25  ;;  %2722 = vmatpush3.bf16.msra.mxu0 %v2721_v27  ;;  %v1535_v27 = vld [vmem:[#allocation6 + $0x748] sm:$0xff] }
  0xd1   :  { %2754 = vmatpush3.bf16.msra.mxu1 %v2753_v29  ;;  %2724 = vmatprep.subr.bf16.mxu0 %v2723_v30  ;;  %v1520_v29 = vld [vmem:[#allocation6 + $0x6d0] sm:$0xff]  ;;  %v1521_v30 = vld [vmem:[#allocation6 + $0x6d8] sm:$0xff]  ;;  %v2765_v33 = vpack.c.bf16 %v1535_v27, %v1534_v21  ;;  %v3197_v27 = vld [vmem:[#allocation2 + $0x81] sm:$0xff] }
  0xd2   :  { %1197 = vmatmul.mubr.f32.gmra.mrb[68].mxu0 %v1026_v24  ;;  %2756 = vmatprep.subr.bf16.mxu1 %v2755_v35  ;;  %v2763_v24 = vpack.c.bf16 %v1551_v11, %v1550_v10  ;;  %v3192_v35 = vld [vmem:[#allocation2 + $0x71] sm:$0xff]  ;;  %v2735_v52 = vpack.c.bf16 %v1521_v30, %v1520_v29  ;;  %v1506_v10 = vld [vmem:[#allocation6 + $0x660] sm:$0xff]  ;;  %v1507_v11 = vld [vmem:[#allocation6 + $0x668] sm:$0xff] }
  0xd3   :  { %1342 = vmatmul.mubr.f32.gmra.mrb[68].mxu1 %v1027_v45  ;;  %1201 = vmatprep.mubr.f32.mxu0 %v3179_v25  ;;  %v1557_v21 = vld [vmem:[#allocation6 + $0x7f8] sm:$0xff]  ;;  %v2741_v29 = vpack.c.bf16 %v1507_v11, %v1506_v10  ;;  %v2793_v11 = vld [vmem:[#allocation2 + $0x101] sm:$0xff] }
  0xd4   :  { %1346 = vmatprep.mubr.f32.mxu1 %v3184_v44  ;;  %2726 = vmatpush3.bf16.msra.mxu0 %v2725_v48  ;;  %v2767_v48 = vpack.c.bf16 %v1553_v32, %v1552_v31  ;;  %v3199_v30 = vld [vmem:[#allocation2 + $0x91] sm:$0xff] }
  0xd5   :  { %2758 = vmatpush3.bf16.msra.mxu1 %v2757_v49  ;;  %2728 = vmatprep.subr.bf16.mxu0 %v2727_v53  ;;  %v1537_v49 = vld [vmem:[#allocation6 + $0x758] sm:$0xff]  ;;  %v1522_v53 = vld [vmem:[#allocation6 + $0x6e0] sm:$0xff] }
  0xd6   :  { %1202 = vmatmul.mubr.f32.gmra.mrb[70].mxu0 %v1027_v45  ;;  %2760 = vmatprep.subr.bf16.mxu1 %v2759_v41  ;;  %v1536_v45 = vld [vmem:[#allocation6 + $0x750] sm:$0xff]  ;;  %v2739_v6 = vpack.c.bf16 %v1523_v54, %v1522_v53  ;;  %v2788_v53 = vld [vmem:[#allocation2] sm:$0xff] }
  0xd7   :  { %1347 = vmatmul.mubr.f32.gmra.mrb[70].mxu1 %v1028_v12  ;;  %1206 = vmatprep.mubr.f32.mxu0 %v3184_v44  ;;  %v1030_v41 = vld [vmem:[#allocation2 + $0x70] sm:$0xff]  ;;  %v2769_v3 = vpack.c.bf16 %v1537_v49, %v1536_v45 }
  0xd8   :  { %1351 = vmatprep.mubr.f32.mxu1 %v3188_v62  ;;  %2730 = vmatpush3.bf16.msra.mxu0 %v2729_v15  ;;  %v2771_v15 = vpack.c.bf16 %v1555_v23, %v1554_v58  ;;  %v3204_v45 = vld [vmem:[#allocation2 + $0xb1] sm:$0xff]  ;;  %v3207_v58 = vld [vmem:[#allocation2 + $0xc1] sm:$0xff] }
  0xd9   :  { %2762 = vmatpush3.bf16.msra.mxu1 %v2761_v16  ;;  %2732 = vmatprep.subr.bf16.mxu0 %v2731_v17  ;;  %v1539_v16 = vld [vmem:[#allocation6 + $0x768] sm:$0xff]  ;;  %v1524_v17 = vld [vmem:[#allocation6 + $0x6f0] sm:$0xff]  ;;  %v1001_v23 = vld [vmem:[#allocation2 + $0xc0] sm:$0xff] }
  0xda   :  { %1207 = vmatmul.mubr.f32.gmra.mrb[72].mxu0 %v1028_v12  ;;  %2764 = vmatprep.subr.bf16.mxu1 %v2763_v24  ;;  %v1538_v12 = vld [vmem:[#allocation6 + $0x760] sm:$0xff]  ;;  %v2743_v32 = vpack.c.bf16 %v1525_v28, %v1524_v17  ;;  %v1000_v54 = vld [vmem:[#allocation2 + $0xb0] sm:$0xff] }
  0xdb   :  { %1352 = vmatmul.mubr.f32.gmra.mrb[72].mxu1 %v1029_v34  ;;  %1211 = vmatprep.mubr.f32.mxu0 %v3188_v62  ;;  %v2787_v24 = vld [vmem:[#allocation2 + $0x81] sm:$0xff]  ;;  %v2773_v31 = vpack.c.bf16 %v1539_v16, %v1538_v12  ;;  %v2792_v10 = vld [vmem:[#allocation2 + $0xf1] sm:$0xff] }
  0xdc   :  { %1356 = vmatprep.mubr.f32.mxu1 %v3192_v35  ;;  %2734 = vmatpush3.bf16.msra.mxu0 %v2733_v38  ;;  %v1509_v38 = vld [vmem:[#allocation6 + $0x678] sm:$0xff] }
  0xdd   :  { %2766 = vmatpush3.bf16.msra.mxu1 %v2765_v33  ;;  %2736 = vmatprep.subr.bf16.mxu0 %v2735_v52  ;;  %v2775_v33 = vpack.c.bf16 %v1557_v21, %v1556_v46  ;;  %v1540_v52 = vld [vmem:[#allocation6 + $0x770] sm:$0xff] }
  0xde   :  { %1212 = vmatmul.mubr.f32.gmra.mrb[74].mxu0 %v1029_v34  ;;  %2768 = vmatprep.subr.bf16.mxu1 %v2767_v48  ;;  %v1508_v34 = vld [vmem:[#allocation6 + $0x670] sm:$0xff]  ;;  %v2777_v49 = vpack.c.bf16 %v1541_v39, %v1540_v52 }
  0xdf   :  { %1357 = vmatmul.mubr.f32.gmra.mrb[74].mxu1 %v1030_v41  ;;  %1216 = vmatprep.mubr.f32.mxu0 %v3192_v35  ;;  %v2745_v48 = vpack.c.bf16 %v1509_v38, %v1508_v34  ;;  %v2794_v12 = vld [vmem:[#allocation2 + $0x111] sm:$0xff] }
  0xe0   :  { %1361 = vmatprep.mubr.f32.mxu1 %v2787_v24  ;;  %2738 = vmatpush3.bf16.msra.mxu0 %v2737_v57  ;;  %v3211_v57 = vld [vmem:[#allocation2 + $0xd1] sm:$0xff] }
  0xe1   :  { %2770 = vmatpush3.bf16.msra.mxu1 %v2769_v3  ;;  %2740 = vmatprep.subr.bf16.mxu0 %v2739_v6  ;;  %v2791_v3 = vld [vmem:[#allocation2 + $0xe1] sm:$0xff] }
  0xe2   :  { %1217 = vmatmul.mubr.f32.gmra.mrb[76].mxu0 %v1030_v41  ;;  %2772 = vmatprep.subr.bf16.mxu1 %v2771_v15  ;;  %v2790_v41 = vld [vmem:[#allocation2 + $0xd1] sm:$0xff]  ;;  %v3215_v6 = vld [vmem:[#allocation2 + $0xe1] sm:$0xff] }
  0xe3   :  { %1362 = vmatmul.mubr.f32.gmra.mrb[76].mxu1 %v3027_v50  ;;  %1221 = vmatprep.mubr.f32.mxu0 %v3197_v27  ;;  %v2789_v50 = vld [vmem:[#allocation2 + $0xc1] sm:$0xff] }
  0xe4   :  { %1366 = vmatprep.mubr.f32.mxu1 %v3199_v30  ;;  %2742 = vmatpush3.bf16.msra.mxu0 %v2741_v29 }
  0xe5   :  { %2774 = vmatpush3.bf16.msra.mxu1 %v2773_v31  ;;  %2744 = vmatprep.subr.bf16.mxu0 %v2743_v32 }
  0xe6   :  { %1222 = vmatmul.mubr.f32.gmra.mrb[78].mxu0 %v999_v42  ;;  %2776 = vmatprep.subr.bf16.mxu1 %v2775_v33 }
  0xe7   :  { %1367 = vmatmul.mubr.f32.gmra.mrb[78].mxu1 %v2788_v53  ;;  %1226 = vmatprep.mubr.f32.mxu0 %v3204_v45 }
  0xe8   :  { %1371 = vmatprep.mubr.f32.mxu1 %v2789_v50  ;;  %2746 = vmatpush3.bf16.msra.mxu0 %v2745_v48 }
  0xe9   :  { %2778 = vmatpush3.bf16.msra.mxu1 %v2777_v49 }
  0xea   :  { %1227 = vmatmul.mubr.f32.gmra.mrb[80].mxu0 %v1000_v54 }
  0xeb   :  { %1372 = vmatmul.mubr.f32.gmra.mrb[80].mxu1 %v3037_v60  ;;  %1231 = vmatprep.mubr.f32.mxu0 %v3207_v58  ;;  %v1003_v60 = vld [vmem:[#allocation2 + $0xe0] sm:$0xff] }
  0xec   :  { %1376 = vmatprep.mubr.f32.mxu1 %v2790_v41 }
  0xee   :  { %1232 = vmatmul.mubr.f32.gmra.mrb[82].mxu0 %v1001_v23 }
  0xef   :  { %1377 = vmatmul.mubr.f32.gmra.mrb[82].mxu1 %v3042_v61  ;;  %1236 = vmatprep.mubr.f32.mxu0 %v3211_v57 }
  0xf0   :  { %1381 = vmatprep.mubr.f32.mxu1 %v2791_v3 }
  0xf2   :  { %1237 = vmatmul.mubr.f32.gmra.mrb[84].mxu0 %v3042_v61  ;;  %v3226_v61 = vld [vmem:[#allocation2 + $0x131] sm:$0xff] }
  0xf3   :  { %1382 = vmatmul.mubr.f32.gmra.mrb[84].mxu1 %v3048_v0  ;;  %1241 = vmatprep.mubr.f32.mxu0 %v3215_v6  ;;  %v3258_v0 = vld [vmem:[%s3375_s2] ss:$0 sm:$0xff] }
  0xf4   :  { %1386 = vmatprep.mubr.f32.mxu1 %v2792_v10 }
  0xf6   :  { %1242 = vmatmul.mubr.f32.gmra.mrb[86].mxu0 %v1003_v60 }
  0xf7   :  { %1387 = vmatmul.mubr.f32.gmra.mrb[86].mxu1 %v3054_v63  ;;  %1246 = vmatprep.mubr.f32.mxu0 %v2792_v10 }
  0xf8   :  { %1391 = vmatprep.mubr.f32.mxu1 %v2793_v11 }
  0xfa   :  { %1247 = vmatmul.mubr.f32.gmra.mrb[88].mxu0 %v3054_v63 }
  0xfb   :  { %1392 = vmatmul.mubr.f32.gmra.mrb[88].mxu1 %v3060_v1  ;;  %1251 = vmatprep.mubr.f32.mxu0 %v2793_v11 }
  0xfc   :  { %1396 = vmatprep.mubr.f32.mxu1 %v2794_v12 }
  0xfe   :  { %1252 = vmatmul.mubr.f32.gmra.mrb[90].mxu0 %v3060_v1 }
  0xff   :  { %1397 = vmatmul.mubr.f32.gmra.mrb[90].mxu1 %v3066_v2  ;;  %1256 = vmatprep.mubr.f32.mxu0 %v2794_v12 }
 0x100   :  { %1401 = vmatprep.mubr.f32.mxu1 %v3019_v13 }
 0x102   :  { %1257 = vmatmul.mubr.f32.gmra.mrb[92].mxu0 %v3066_v2 }
 0x103   :  { %1402 = vmatmul.mubr.f32.gmra.mrb[92].mxu1 %v3072_v5  ;;  %1261 = vmatprep.mubr.f32.mxu0 %v3019_v13 }
 0x104   :  { %1406 = vmatprep.mubr.f32.mxu1 %v3226_v61 }
 0x106   :  { %1262 = vmatmul.mubr.f32.gmra.mrb[94].mxu0 %v3072_v5 }
 0x107   :  { %1407 = vmatmul.mubr.f32.gmra.mrb[94].mxu1 %v2788_v53  ;;  %1622 = vmatprep.mubr.f32.mxu0 %v3074_v8 }
 0x108   :  { %1767 = vmatprep.mubr.f32.mxu1 %v3079_v20 }
 0x10a   :  { %1623 = vmatmul.mubr.f32.vlgmr.msra.gmra.mrb[96].mxu0 %v3168_v40 }
 0x10b   :  { %1768 = vmatmul.mubr.f32.vlgmr.msra.gmra.mrb[96].mxu1 %v3170_v47  ;;  %1627 = vmatprep.mubr.f32.mxu0 %v3079_v20 }
 0x10c   :  { %1772 = vmatprep.mubr.f32.mxu1 %v3084_v36 }
 0x10e   :  { %1628 = vmatmul.mubr.f32.gmra.mrb[98].mxu0 %v3170_v47 }
 0x10f   :  { %1773 = vmatmul.mubr.f32.gmra.mrb[98].mxu1 %v3176_v7  ;;  %1632 = vmatprep.mubr.f32.mxu0 %v3084_v36 }
 0x110   :  { %1777 = vmatprep.mubr.f32.mxu1 %v3091_v55 }
 0x112   :  { %1633 = vmatmul.mubr.f32.gmra.mrb[100].mxu0 %v3176_v7 }
 0x113   :  { %1778 = vmatmul.mubr.f32.gmra.mrb[100].mxu1 %v3179_v25  ;;  %1637 = vmatprep.mubr.f32.mxu0 %v3091_v55  ;;  %v1484_v55 = vld [vmem:[#allocation2 + $0x92] sm:$0xff] }
 0x114   :  { %1782 = vmatprep.mubr.f32.mxu1 %v3097_v18 }
 0x116   :  { %1638 = vmatmul.mubr.f32.gmra.mrb[102].mxu0 %v3179_v25 }
 0x117   :  { %1783 = vmatmul.mubr.f32.gmra.mrb[102].mxu1 %v3184_v44  ;;  %1642 = vmatprep.mubr.f32.mxu0 %v3097_v18 }
 0x118   :  { %1787 = vmatprep.mubr.f32.mxu1 %v3103_v37 }
 0x11a   :  { %1643 = vmatmul.mubr.f32.gmra.mrb[104].mxu0 %v3184_v44 }
 0x11b   :  { %1788 = vmatmul.mubr.f32.gmra.mrb[104].mxu1 %v3188_v62  ;;  %1647 = vmatprep.mubr.f32.mxu0 %v3103_v37 }
 0x11c   :  { %1792 = vmatprep.mubr.f32.mxu1 %v3109_v56 }
 0x11d   :  { %v1915_v13 = vpop.f32.mrb[0].mxu0 }
 0x11e   :  { %v1916_v63 = vpop.f32.mrb[1].mxu0  ;;  %1648 = vmatmul.mubr.f32.gmra.mrb[106].mxu0 %v3188_v62  ;;  %v1995_v1 = vpop.f32.mrb[0].mxu1 }
 0x11f   :  { %v1917_v2 = vadd.f32 %v1916_v63, %v1915_v13  ;;  %v1996_v5 = vpop.f32.mrb[1].mxu1  ;;  %1793 = vmatmul.mubr.f32.gmra.mrb[106].mxu1 %v3192_v35  ;;  %1652 = vmatprep.mubr.f32.mxu0 %v3109_v56 }
 0x120   :  { %v1997_v8 = vadd.f32 %v1996_v5, %v1995_v1  ;;  %1797 = vmatprep.mubr.f32.mxu1 %v3115_v19 }
 0x121   :  { %v318_v20 = vadd.f32 %v1917_v2, %v3258_v0  ;;  %v1918_v36 = vpop.f32.mrb[2].mxu0 }
 0x122   :  { %v1919_v18 = vpop.f32.mrb[3].mxu0  ;;  %1653 = vmatmul.mubr.f32.gmra.mrb[108].mxu0 %v3192_v35  ;;  %v1998_v37 = vpop.f32.mrb[2].mxu1 }
 0x123   :  { %v463_v40 = vadd.f32 %v1997_v8, %v318_v20  ;;  %v1920_v47 = vadd.f32 %v1919_v18, %v1918_v36  ;;  %v1999_v7 = vpop.f32.mrb[3].mxu1  ;;  %1798 = vmatmul.mubr.f32.gmra.mrb[108].mxu1 %v3197_v27  ;;  %1657 = vmatprep.mubr.f32.mxu0 %v3115_v19 }
 0x124   :  { %v2000_v25 = vadd.f32 %v1999_v7, %v1998_v37  ;;  %1802 = vmatprep.mubr.f32.mxu1 %v1484_v55 }
 0x125   :  { %541 = vst [vmem:[#allocation8] sm:$0xff] %v463_v40  ;;  %v323_v56 = vadd.f32 %v1920_v47, %v3258_v0  ;;  %v1921_v44 = vpop.f32.mrb[4].mxu0 }
 0x126   :  { %v1922_v62 = vpop.f32.mrb[5].mxu0  ;;  %1658 = vmatmul.mubr.f32.gmra.mrb[110].mxu0 %v3197_v27  ;;  %v2001_v15 = vpop.f32.mrb[4].mxu1 }
 0x127   :  { %v468_v16 = vadd.f32 %v2000_v25, %v323_v56  ;;  %v1923_v35 = vadd.f32 %v1922_v62, %v1921_v44  ;;  %v2002_v17 = vpop.f32.mrb[5].mxu1  ;;  %1803 = vmatmul.mubr.f32.gmra.mrb[110].mxu1 %v3199_v30  ;;  %1662 = vmatprep.mubr.f32.mxu0 %v3121_v14  ;;  %v1492_v62 = vld [vmem:[#allocation2 + $0x132] sm:$0xff] }
 0x128   :  { %v2003_v28 = vadd.f32 %v2002_v17, %v2001_v15  ;;  %1807 = vmatprep.mubr.f32.mxu1 %v3126_v43 }
 0x129   :  { %542 = vst [vmem:[#allocation8 + $0x20] sm:$0xff] %v468_v16  ;;  %v328_v19 = vadd.f32 %v1923_v35, %v3258_v0  ;;  %v1924_v46 = vpop.f32.mrb[6].mxu0 }
 0x12a   :  { %v1925_v21 = vpop.f32.mrb[7].mxu0  ;;  %1663 = vmatmul.mubr.f32.gmra.mrb[112].mxu0 %v3204_v45  ;;  %v2004_v24 = vpop.f32.mrb[6].mxu1 }
 0x12b   :  { %v473_v27 = vadd.f32 %v2003_v28, %v328_v19  ;;  %v1926_v29 = vadd.f32 %v1925_v21, %v1924_v46  ;;  %v2005_v31 = vpop.f32.mrb[7].mxu1  ;;  %1808 = vmatmul.mubr.f32.gmra.mrb[112].mxu1 %v3207_v58  ;;  %1667 = vmatprep.mubr.f32.mxu0 %v3126_v43 }
 0x12c   :  { %v2006_v30 = vadd.f32 %v2005_v31, %v2004_v24  ;;  %1812 = vmatprep.mubr.f32.mxu1 %v3132_v59 }
 0x12d   :  { %543 = vst [vmem:[#allocation8 + $0x40] sm:$0xff] %v473_v27  ;;  %v333_v14 = vadd.f32 %v1926_v29, %v3258_v0  ;;  %v1927_v32 = vpop.f32.mrb[8].mxu0 }
 0x12e   :  { %v1928_v34 = vpop.f32.mrb[9].mxu0  ;;  %1668 = vmatmul.mubr.f32.gmra.mrb[114].mxu0 %v3207_v58  ;;  %v2007_v38 = vpop.f32.mrb[8].mxu1 }
 0x12f   :  { %v478_v33 = vadd.f32 %v2006_v30, %v333_v14  ;;  %v1929_v52 = vadd.f32 %v1928_v34, %v1927_v32  ;;  %v2008_v39 = vpop.f32.mrb[9].mxu1  ;;  %1813 = vmatmul.mubr.f32.gmra.mrb[114].mxu1 %v3211_v57  ;;  %1672 = vmatprep.mubr.f32.mxu0 %v3132_v59  ;;  %v1472_v59 = vld [vmem:[#allocation2 + $0xf1] sm:$0xff] }
 0x130   :  { %v2009_v42 = vadd.f32 %v2008_v39, %v2007_v38  ;;  %1817 = vmatprep.mubr.f32.mxu1 %v3138_v4 }
 0x131   :  { %544 = vst [vmem:[#allocation8 + $0x60] sm:$0xff] %v478_v33  ;;  %v338_v43 = vadd.f32 %v1929_v52, %v3258_v0  ;;  %v1930_v45 = vpop.f32.mrb[10].mxu0 }
 0x132   :  { %v1931_v48 = vpop.f32.mrb[11].mxu0  ;;  %1673 = vmatmul.mubr.f32.gmra.mrb[116].mxu0 %v3211_v57  ;;  %v2010_v49 = vpop.f32.mrb[10].mxu1 }
 0x133   :  { %v483_v53 = vadd.f32 %v2009_v42, %v338_v43  ;;  %v1932_v54 = vadd.f32 %v1931_v48, %v1930_v45  ;;  %v2011_v50 = vpop.f32.mrb[11].mxu1  ;;  %1818 = vmatmul.mubr.f32.gmra.mrb[116].mxu1 %v3215_v6  ;;  %1677 = vmatprep.mubr.f32.mxu0 %v3138_v4  ;;  %v1473_v4 = vld [vmem:[#allocation2 + $0x101] sm:$0xff] }
 0x134   :  { %v2012_v58 = vadd.f32 %v2011_v50, %v2010_v49  ;;  %1822 = vmatprep.mubr.f32.mxu1 %v3144_v51 }
 0x135   :  { %545 = vst [vmem:[#allocation8 + $0x80] sm:$0xff] %v483_v53  ;;  %v343_v23 = vadd.f32 %v1932_v54, %v3258_v0  ;;  %v1933_v41 = vpop.f32.mrb[12].mxu0 }
 0x136   :  { %v1934_v3 = vpop.f32.mrb[13].mxu0  ;;  %1678 = vmatmul.mubr.f32.gmra.mrb[118].mxu0 %v3215_v6  ;;  %v2013_v57 = vpop.f32.mrb[12].mxu1 }
 0x137   :  { %v488_v60 = vadd.f32 %v2012_v58, %v343_v23  ;;  %v1935_v10 = vadd.f32 %v1934_v3, %v1933_v41  ;;  %v2014_v11 = vpop.f32.mrb[13].mxu1  ;;  %1823 = vmatmul.mubr.f32.gmra.mrb[118].mxu1 %v1472_v59  ;;  %1682 = vmatprep.mubr.f32.mxu0 %v3144_v51  ;;  %v1474_v51 = vld [vmem:[#allocation2 + $0x111] sm:$0xff] }
 0x138   :  { %v2015_v12 = vadd.f32 %v2014_v11, %v2013_v57  ;;  %1827 = vmatprep.mubr.f32.mxu1 %v3150_v9 }
 0x139   :  { %546 = vst [vmem:[#allocation8 + $0xa0] sm:$0xff] %v488_v60  ;;  %v348_v13 = vadd.f32 %v1935_v10, %v3258_v0  ;;  %v1936_v63 = vpop.f32.mrb[14].mxu0 }
 0x13a   :  { %v1937_v1 = vpop.f32.mrb[15].mxu0  ;;  %1683 = vmatmul.mubr.f32.gmra.mrb[120].mxu0 %v1472_v59  ;;  %v2016_v2 = vpop.f32.mrb[14].mxu1 }
 0x13b   :  { %v493_v5 = vadd.f32 %v2015_v12, %v348_v13  ;;  %v1938_v6 = vadd.f32 %v1937_v1, %v1936_v63  ;;  %v2017_v8 = vpop.f32.mrb[15].mxu1  ;;  %1828 = vmatmul.mubr.f32.gmra.mrb[120].mxu1 %v1473_v4  ;;  %1687 = vmatprep.mubr.f32.mxu0 %v3150_v9  ;;  %v1475_v9 = vld [vmem:[#allocation2 + $0x121] sm:$0xff] }
 0x13c   :  { %v2018_v20 = vadd.f32 %v2017_v8, %v2016_v2  ;;  %1832 = vmatprep.mubr.f32.mxu1 %v3156_v22 }
 0x13d   :  { %547 = vst [vmem:[#allocation8 + $0xc0] sm:$0xff] %v493_v5  ;;  %v353_v36 = vadd.f32 %v1938_v6, %v3258_v0  ;;  %v1939_v55 = vpop.f32.mrb[16].mxu0 }
 0x13e   :  { %v1940_v18 = vpop.f32.mrb[17].mxu0  ;;  %1688 = vmatmul.mubr.f32.gmra.mrb[122].mxu0 %v1473_v4  ;;  %v2019_v37 = vpop.f32.mrb[16].mxu1 }
 0x13f   :  { %v498_v40 = vadd.f32 %v2018_v20, %v353_v36  ;;  %v1941_v47 = vadd.f32 %v1940_v18, %v1939_v55  ;;  %v2020_v7 = vpop.f32.mrb[17].mxu1  ;;  %1833 = vmatmul.mubr.f32.gmra.mrb[122].mxu1 %v1474_v51  ;;  %1692 = vmatprep.mubr.f32.mxu0 %v3156_v22 }
 0x140   :  { %v2021_v25 = vadd.f32 %v2020_v7, %v2019_v37  ;;  %1837 = vmatprep.mubr.f32.mxu1 %v3162_v26 }
 0x141   :  { %548 = vst [vmem:[#allocation8 + $0xe0] sm:$0xff] %v498_v40  ;;  %v358_v56 = vadd.f32 %v1941_v47, %v3258_v0  ;;  %v1942_v44 = vpop.f32.mrb[18].mxu0 }
 0x142   :  { %v1943_v15 = vpop.f32.mrb[19].mxu0  ;;  %1693 = vmatmul.mubr.f32.gmra.mrb[124].mxu0 %v1474_v51  ;;  %v2022_v16 = vpop.f32.mrb[18].mxu1 }
 0x143   :  { %v503_v35 = vadd.f32 %v2021_v25, %v358_v56  ;;  %v1944_v17 = vadd.f32 %v1943_v15, %v1942_v44  ;;  %v2023_v28 = vpop.f32.mrb[19].mxu1  ;;  %1838 = vmatmul.mubr.f32.gmra.mrb[124].mxu1 %v1475_v9  ;;  %1697 = vmatprep.mubr.f32.mxu0 %v3162_v26 }
 0x144   :  { %v2024_v19 = vadd.f32 %v2023_v28, %v2022_v16  ;;  %1842 = vmatprep.mubr.f32.mxu1 %v1492_v62 }
 0x145   :  { %549 = vst [vmem:[#allocation8 + $0x100] sm:$0xff] %v503_v35  ;;  %v363_v22 = vadd.f32 %v1944_v17, %v3258_v0  ;;  %v1945_v46 = vpop.f32.mrb[20].mxu0 }
 0x146   :  { %v1946_v21 = vpop.f32.mrb[21].mxu0  ;;  %1698 = vmatmul.mubr.f32.gmra.mrb[126].mxu0 %v1475_v9  ;;  %v2025_v24 = vpop.f32.mrb[20].mxu1 }
 0x147   :  { %v508_v27 = vadd.f32 %v2024_v19, %v363_v22  ;;  %v1947_v29 = vadd.f32 %v1946_v21, %v1945_v46  ;;  %v2026_v31 = vpop.f32.mrb[21].mxu1  ;;  %1843 = vmatmul.mubr.f32.gmra.mrb[126].mxu1 %v3226_v61 }
 0x148   :  { %v2027_v30 = vadd.f32 %v2026_v31, %v2025_v24 }
 0x149   :  { %550 = vst [vmem:[#allocation8 + $0x120] sm:$0xff] %v508_v27  ;;  %v368_v14 = vadd.f32 %v1947_v29, %v3258_v0  ;;  %v1948_v32 = vpop.f32.mrb[22].mxu0 }
 0x14a   :  { %v1949_v26 = vpop.f32.mrb[23].mxu0  ;;  %v2028_v34 = vpop.f32.mrb[22].mxu1 }
 0x14b   :  { %v513_v38 = vadd.f32 %v2027_v30, %v368_v14  ;;  %v1950_v33 = vadd.f32 %v1949_v26, %v1948_v32  ;;  %v2029_v52 = vpop.f32.mrb[23].mxu1 }
 0x14c   :  { %v2030_v39 = vadd.f32 %v2029_v52, %v2028_v34 }
 0x14d   :  { %551 = vst [vmem:[#allocation8 + $0x140] sm:$0xff] %v513_v38  ;;  %v373_v42 = vadd.f32 %v1950_v33, %v3258_v0  ;;  %v1951_v43 = vpop.f32.mrb[24].mxu0 }
 0x14e   :  { %v1952_v45 = vpop.f32.mrb[25].mxu0  ;;  %v2031_v48 = vpop.f32.mrb[24].mxu1 }
 0x14f   :  { %v518_v49 = vadd.f32 %v2030_v39, %v373_v42  ;;  %v1953_v53 = vadd.f32 %v1952_v45, %v1951_v43  ;;  %v2032_v61 = vpop.f32.mrb[25].mxu1 }
 0x150   :  { %v2033_v54 = vadd.f32 %v2032_v61, %v2031_v48 }
 0x151   :  { %552 = vst [vmem:[#allocation8 + $0x160] sm:$0xff] %v518_v49  ;;  %v378_v50 = vadd.f32 %v1953_v53, %v3258_v0  ;;  %v1954_v58 = vpop.f32.mrb[26].mxu0 }
 0x152   :  { %v1955_v59 = vpop.f32.mrb[27].mxu0  ;;  %v2034_v23 = vpop.f32.mrb[26].mxu1 }
 0x153   :  { %v523_v41 = vadd.f32 %v2033_v54, %v378_v50  ;;  %v1956_v3 = vadd.f32 %v1955_v59, %v1954_v58  ;;  %v2035_v57 = vpop.f32.mrb[27].mxu1 }
 0x154   :  { %v2036_v60 = vadd.f32 %v2035_v57, %v2034_v23 }
 0x155   :  { %553 = vst [vmem:[#allocation8 + $0x180] sm:$0xff] %v523_v41  ;;  %v383_v10 = vadd.f32 %v1956_v3, %v3258_v0  ;;  %v1957_v11 = vpop.f32.mrb[28].mxu0 }
 0x156   :  { %v1958_v12 = vpop.f32.mrb[29].mxu0  ;;  %v2037_v4 = vpop.f32.mrb[28].mxu1 }
 0x157   :  { %v528_v13 = vadd.f32 %v2036_v60, %v383_v10  ;;  %v1959_v63 = vadd.f32 %v1958_v12, %v1957_v11  ;;  %v2038_v1 = vpop.f32.mrb[29].mxu1 }
 0x158   :  { %v2039_v2 = vadd.f32 %v2038_v1, %v2037_v4 }
 0x159   :  { %554 = vst [vmem:[#allocation8 + $0x1a0] sm:$0xff] %v528_v13  ;;  %v388_v5 = vadd.f32 %v1959_v63, %v3258_v0  ;;  %v1960_v6 = vpop.f32.mrb[30].mxu0 }
 0x15a   :  { %v1961_v8 = vpop.f32.mrb[31].mxu0  ;;  %v2040_v20 = vpop.f32.mrb[30].mxu1 }
 0x15b   :  { %v533_v51 = vadd.f32 %v2039_v2, %v388_v5  ;;  %v1962_v36 = vadd.f32 %v1961_v8, %v1960_v6  ;;  %v2041_v55 = vpop.f32.mrb[31].mxu1 }
 0x15c   :  { %v2042_v18 = vadd.f32 %v2041_v55, %v2040_v20 }
 0x15d   :  { %555 = vst [vmem:[#allocation8 + $0x1c0] sm:$0xff] %v533_v51  ;;  %v393_v37 = vadd.f32 %v1962_v36, %v3258_v0  ;;  %v2075_v40 = vpop.f32.mrb[32].mxu0 }
 0x15e   :  { %v2076_v47 = vpop.f32.mrb[33].mxu0  ;;  %v2155_v7 = vpop.f32.mrb[32].mxu1 }
 0x15f   :  { %v538_v25 = vadd.f32 %v2042_v18, %v393_v37  ;;  %v2077_v9 = vadd.f32 %v2076_v47, %v2075_v40  ;;  %v2156_v56 = vpop.f32.mrb[33].mxu1 }
 0x160   :  { %v2157_v44 = vadd.f32 %v2156_v56, %v2155_v7 }
 0x161   :  { %556 = vst [vmem:[#allocation8 + $0x1e0] sm:$0xff] %v538_v25  ;;  %v753_v62 = vadd.f32 %v2077_v9, %v3258_v0  ;;  %v2078_v15 = vpop.f32.mrb[34].mxu0 }
 0x162   :  { %v2079_v16 = vpop.f32.mrb[35].mxu0  ;;  %v2158_v35 = vpop.f32.mrb[34].mxu1 }
 0x163   :  { %v898_v17 = vadd.f32 %v2157_v44, %v753_v62  ;;  %v2080_v28 = vadd.f32 %v2079_v16, %v2078_v15  ;;  %v2159_v19 = vpop.f32.mrb[35].mxu1 }
 0x164   :  { %v2160_v22 = vadd.f32 %v2159_v19, %v2158_v35 }
 0x165   :  { %976 = vst [vmem:[#allocation8 + $0x8] sm:$0xff] %v898_v17  ;;  %v758_v46 = vadd.f32 %v2080_v28, %v3258_v0  ;;  %v2081_v21 = vpop.f32.mrb[36].mxu0 }
 0x166   :  { %v2082_v24 = vpop.f32.mrb[37].mxu0  ;;  %v2161_v27 = vpop.f32.mrb[36].mxu1 }
 0x167   :  { %v903_v29 = vadd.f32 %v2160_v22, %v758_v46  ;;  %v2083_v31 = vadd.f32 %v2082_v24, %v2081_v21  ;;  %v2162_v30 = vpop.f32.mrb[37].mxu1 }
 0x168   :  { %v2163_v14 = vadd.f32 %v2162_v30, %v2161_v27 }
 0x169   :  { %977 = vst [vmem:[#allocation8 + $0x28] sm:$0xff] %v903_v29  ;;  %v763_v32 = vadd.f32 %v2083_v31, %v3258_v0  ;;  %v2084_v26 = vpop.f32.mrb[38].mxu0 }
 0x16a   :  { %v2085_v34 = vpop.f32.mrb[39].mxu0  ;;  %v2164_v38 = vpop.f32.mrb[38].mxu1 }
 0x16b   :  { %v908_v33 = vadd.f32 %v2163_v14, %v763_v32  ;;  %v2086_v52 = vadd.f32 %v2085_v34, %v2084_v26  ;;  %v2165_v39 = vpop.f32.mrb[39].mxu1 }
 0x16c   :  { %v2166_v42 = vadd.f32 %v2165_v39, %v2164_v38 }
 0x16d   :  { %978 = vst [vmem:[#allocation8 + $0x48] sm:$0xff] %v908_v33  ;;  %v768_v43 = vadd.f32 %v2086_v52, %v3258_v0  ;;  %v2087_v45 = vpop.f32.mrb[40].mxu0 }
 0x16e   :  { %v2088_v48 = vpop.f32.mrb[41].mxu0  ;;  %v2167_v49 = vpop.f32.mrb[40].mxu1 }
 0x16f   :  { %v913_v53 = vadd.f32 %v2166_v42, %v768_v43  ;;  %v2089_v61 = vadd.f32 %v2088_v48, %v2087_v45  ;;  %v2168_v54 = vpop.f32.mrb[41].mxu1 }
 0x170   :  { %v2169_v50 = vadd.f32 %v2168_v54, %v2167_v49 }
 0x171   :  { %979 = vst [vmem:[#allocation8 + $0x68] sm:$0xff] %v913_v53  ;;  %v773_v58 = vadd.f32 %v2089_v61, %v3258_v0  ;;  %v2090_v59 = vpop.f32.mrb[42].mxu0 }
 0x172   :  { %v2091_v23 = vpop.f32.mrb[43].mxu0  ;;  %v2170_v41 = vpop.f32.mrb[42].mxu1 }
 0x173   :  { %v918_v3 = vadd.f32 %v2169_v50, %v773_v58  ;;  %v2092_v57 = vadd.f32 %v2091_v23, %v2090_v59  ;;  %v2171_v60 = vpop.f32.mrb[43].mxu1 }
 0x174   :  { %v2172_v10 = vadd.f32 %v2171_v60, %v2170_v41 }
 0x175   :  { %980 = vst [vmem:[#allocation8 + $0x88] sm:$0xff] %v918_v3  ;;  %v778_v11 = vadd.f32 %v2092_v57, %v3258_v0  ;;  %v2093_v12 = vpop.f32.mrb[44].mxu0 }
 0x176   :  { %v2094_v4 = vpop.f32.mrb[45].mxu0  ;;  %v2173_v13 = vpop.f32.mrb[44].mxu1 }
 0x177   :  { %v923_v63 = vadd.f32 %v2172_v10, %v778_v11  ;;  %v2095_v1 = vadd.f32 %v2094_v4, %v2093_v12  ;;  %v2174_v2 = vpop.f32.mrb[45].mxu1 }
 0x178   :  { %v2175_v5 = vadd.f32 %v2174_v2, %v2173_v13 }
 0x179   :  { %981 = vst [vmem:[#allocation8 + $0xa8] sm:$0xff] %v923_v63  ;;  %v783_v6 = vadd.f32 %v2095_v1, %v3258_v0  ;;  %v2096_v8 = vpop.f32.mrb[46].mxu0 }
 0x17a   :  { %v2097_v20 = vpop.f32.mrb[47].mxu0  ;;  %v2176_v51 = vpop.f32.mrb[46].mxu1 }
 0x17b   :  { %v928_v36 = vadd.f32 %v2175_v5, %v783_v6  ;;  %v2098_v55 = vadd.f32 %v2097_v20, %v2096_v8  ;;  %v2177_v18 = vpop.f32.mrb[47].mxu1 }
 0x17c   :  { %v2178_v37 = vadd.f32 %v2177_v18, %v2176_v51 }
 0x17d   :  { %982 = vst [vmem:[#allocation8 + $0xc8] sm:$0xff] %v928_v36  ;;  %v788_v40 = vadd.f32 %v2098_v55, %v3258_v0  ;;  %v2099_v47 = vpop.f32.mrb[48].mxu0 }
 0x17e   :  { %v2100_v7 = vpop.f32.mrb[49].mxu0  ;;  %v2179_v25 = vpop.f32.mrb[48].mxu1 }
 0x17f   :  { %v933_v9 = vadd.f32 %v2178_v37, %v788_v40  ;;  %v2101_v56 = vadd.f32 %v2100_v7, %v2099_v47  ;;  %v2180_v44 = vpop.f32.mrb[49].mxu1 }
 0x180   :  { %v2181_v62 = vadd.f32 %v2180_v44, %v2179_v25 }
 0x181   :  { %983 = vst [vmem:[#allocation8 + $0xe8] sm:$0xff] %v933_v9  ;;  %v793_v15 = vadd.f32 %v2101_v56, %v3258_v0  ;;  %v2102_v16 = vpop.f32.mrb[50].mxu0 }
 0x182   :  { %v2103_v35 = vpop.f32.mrb[51].mxu0  ;;  %v2182_v17 = vpop.f32.mrb[50].mxu1 }
 0x183   :  { %v938_v28 = vadd.f32 %v2181_v62, %v793_v15  ;;  %v2104_v19 = vadd.f32 %v2103_v35, %v2102_v16  ;;  %v2183_v22 = vpop.f32.mrb[51].mxu1 }
 0x184   :  { %v2184_v46 = vadd.f32 %v2183_v22, %v2182_v17 }
 0x185   :  { %984 = vst [vmem:[#allocation8 + $0x108] sm:$0xff] %v938_v28  ;;  %v798_v21 = vadd.f32 %v2104_v19, %v3258_v0  ;;  %v2105_v24 = vpop.f32.mrb[52].mxu0 }
 0x186   :  { %v2106_v27 = vpop.f32.mrb[53].mxu0  ;;  %v2185_v29 = vpop.f32.mrb[52].mxu1 }
 0x187   :  { %v943_v31 = vadd.f32 %v2184_v46, %v798_v21  ;;  %v2107_v30 = vadd.f32 %v2106_v27, %v2105_v24  ;;  %v2186_v14 = vpop.f32.mrb[53].mxu1 }
 0x188   :  { %v2187_v32 = vadd.f32 %v2186_v14, %v2185_v29 }
 0x189   :  { %985 = vst [vmem:[#allocation8 + $0x128] sm:$0xff] %v943_v31  ;;  %v803_v26 = vadd.f32 %v2107_v30, %v3258_v0  ;;  %v2108_v34 = vpop.f32.mrb[54].mxu0 }
 0x18a   :  { %v2109_v38 = vpop.f32.mrb[55].mxu0  ;;  %v2188_v33 = vpop.f32.mrb[54].mxu1 }
 0x18b   :  { %v948_v52 = vadd.f32 %v2187_v32, %v803_v26  ;;  %v2110_v39 = vadd.f32 %v2109_v38, %v2108_v34  ;;  %v2189_v42 = vpop.f32.mrb[55].mxu1 }
 0x18c   :  { %v2190_v43 = vadd.f32 %v2189_v42, %v2188_v33 }
 0x18d   :  { %986 = vst [vmem:[#allocation8 + $0x148] sm:$0xff] %v948_v52  ;;  %v808_v45 = vadd.f32 %v2110_v39, %v3258_v0  ;;  %v2111_v48 = vpop.f32.mrb[56].mxu0 }
 0x18e   :  { %v2112_v49 = vpop.f32.mrb[57].mxu0  ;;  %v2191_v53 = vpop.f32.mrb[56].mxu1 }
 0x18f   :  { %v953_v61 = vadd.f32 %v2190_v43, %v808_v45  ;;  %v2113_v54 = vadd.f32 %v2112_v49, %v2111_v48  ;;  %v2192_v50 = vpop.f32.mrb[57].mxu1 }
 0x190   :  { %v2193_v58 = vadd.f32 %v2192_v50, %v2191_v53 }
 0x191   :  { %987 = vst [vmem:[#allocation8 + $0x168] sm:$0xff] %v953_v61  ;;  %v813_v59 = vadd.f32 %v2113_v54, %v3258_v0  ;;  %v2114_v23 = vpop.f32.mrb[58].mxu0 }
 0x192   :  { %v2115_v41 = vpop.f32.mrb[59].mxu0  ;;  %v2194_v3 = vpop.f32.mrb[58].mxu1 }
 0x193   :  { %v958_v57 = vadd.f32 %v2193_v58, %v813_v59  ;;  %v2116_v60 = vadd.f32 %v2115_v41, %v2114_v23  ;;  %v2195_v10 = vpop.f32.mrb[59].mxu1 }
 0x194   :  { %v2196_v11 = vadd.f32 %v2195_v10, %v2194_v3 }
 0x195   :  { %988 = vst [vmem:[#allocation8 + $0x188] sm:$0xff] %v958_v57  ;;  %v818_v12 = vadd.f32 %v2116_v60, %v3258_v0  ;;  %v2117_v4 = vpop.f32.mrb[60].mxu0 }
 0x196   :  { %v2118_v13 = vpop.f32.mrb[61].mxu0  ;;  %v2197_v63 = vpop.f32.mrb[60].mxu1 }
 0x197   :  { %v963_v1 = vadd.f32 %v2196_v11, %v818_v12  ;;  %v2119_v2 = vadd.f32 %v2118_v13, %v2117_v4  ;;  %v2198_v5 = vpop.f32.mrb[61].mxu1 }
 0x198   :  { %v2199_v6 = vadd.f32 %v2198_v5, %v2197_v63 }
 0x199   :  { %989 = vst [vmem:[#allocation8 + $0x1a8] sm:$0xff] %v963_v1  ;;  %v823_v8 = vadd.f32 %v2119_v2, %v3258_v0  ;;  %v2120_v20 = vpop.f32.mrb[62].mxu0 }
 0x19a   :  { %v2121_v51 = vpop.f32.mrb[63].mxu0  ;;  %v2200_v36 = vpop.f32.mrb[62].mxu1 }
 0x19b   :  { %v968_v55 = vadd.f32 %v2199_v6, %v823_v8  ;;  %v2122_v18 = vadd.f32 %v2121_v51, %v2120_v20  ;;  %v2201_v37 = vpop.f32.mrb[63].mxu1 }
 0x19c   :  { %v2202_v40 = vadd.f32 %v2201_v37, %v2200_v36 }
 0x19d   :  { %990 = vst [vmem:[#allocation8 + $0x1c8] sm:$0xff] %v968_v55  ;;  %v828_v47 = vadd.f32 %v2122_v18, %v3258_v0  ;;  %v2235_v7 = vpop.f32.mrb[64].mxu0 }
 0x19e   :  { %v2236_v25 = vpop.f32.mrb[65].mxu0  ;;  %v2315_v9 = vpop.f32.mrb[64].mxu1 }
 0x19f   :  { %v973_v56 = vadd.f32 %v2202_v40, %v828_v47  ;;  %v2237_v44 = vadd.f32 %v2236_v25, %v2235_v7  ;;  %v2316_v62 = vpop.f32.mrb[65].mxu1 }
 0x1a0   :  { %v2317_v15 = vadd.f32 %v2316_v62, %v2315_v9 }
 0x1a1   :  { %991 = vst [vmem:[#allocation8 + $0x1e8] sm:$0xff] %v973_v56  ;;  %v1189_v16 = vadd.f32 %v2237_v44, %v3258_v0  ;;  %v2238_v35 = vpop.f32.mrb[66].mxu0 }
 0x1a2   :  { %v2239_v17 = vpop.f32.mrb[67].mxu0  ;;  %v2318_v28 = vpop.f32.mrb[66].mxu1 }
 0x1a3   :  { %v1334_v19 = vadd.f32 %v2317_v15, %v1189_v16  ;;  %v2240_v22 = vadd.f32 %v2239_v17, %v2238_v35  ;;  %v2319_v46 = vpop.f32.mrb[67].mxu1 }
 0x1a4   :  { %v2320_v21 = vadd.f32 %v2319_v46, %v2318_v28 }
 0x1a5   :  { %1413 = vst [vmem:[#allocation8 + $0x10] sm:$0xff] %v1334_v19  ;;  %v1194_v24 = vadd.f32 %v2240_v22, %v3258_v0  ;;  %v2241_v27 = vpop.f32.mrb[68].mxu0 }
 0x1a6   :  { %v2242_v29 = vpop.f32.mrb[69].mxu0  ;;  %v2321_v31 = vpop.f32.mrb[68].mxu1 }
 0x1a7   :  { %v1339_v30 = vadd.f32 %v2320_v21, %v1194_v24  ;;  %v2243_v14 = vadd.f32 %v2242_v29, %v2241_v27  ;;  %v2322_v32 = vpop.f32.mrb[69].mxu1 }
 0x1a8   :  { %v2323_v26 = vadd.f32 %v2322_v32, %v2321_v31 }
 0x1a9   :  { %1414 = vst [vmem:[#allocation8 + $0x30] sm:$0xff] %v1339_v30  ;;  %v1199_v34 = vadd.f32 %v2243_v14, %v3258_v0  ;;  %v2244_v38 = vpop.f32.mrb[70].mxu0 }
 0x1aa   :  { %v2245_v33 = vpop.f32.mrb[71].mxu0  ;;  %v2324_v52 = vpop.f32.mrb[70].mxu1 }
 0x1ab   :  { %v1344_v39 = vadd.f32 %v2323_v26, %v1199_v34  ;;  %v2246_v42 = vadd.f32 %v2245_v33, %v2244_v38  ;;  %v2325_v43 = vpop.f32.mrb[71].mxu1 }
 0x1ac   :  { %v2326_v45 = vadd.f32 %v2325_v43, %v2324_v52 }
 0x1ad   :  { %1415 = vst [vmem:[#allocation8 + $0x50] sm:$0xff] %v1344_v39  ;;  %v1204_v48 = vadd.f32 %v2246_v42, %v3258_v0  ;;  %v2247_v49 = vpop.f32.mrb[72].mxu0 }
 0x1ae   :  { %v2248_v53 = vpop.f32.mrb[73].mxu0  ;;  %v2327_v61 = vpop.f32.mrb[72].mxu1 }
 0x1af   :  { %v1349_v54 = vadd.f32 %v2326_v45, %v1204_v48  ;;  %v2249_v50 = vadd.f32 %v2248_v53, %v2247_v49  ;;  %v2328_v58 = vpop.f32.mrb[73].mxu1 }
 0x1b0   :  { %v2329_v59 = vadd.f32 %v2328_v58, %v2327_v61 }
 0x1b1   :  { %1416 = vst [vmem:[#allocation8 + $0x70] sm:$0xff] %v1349_v54  ;;  %v1209_v23 = vadd.f32 %v2249_v50, %v3258_v0  ;;  %v2250_v41 = vpop.f32.mrb[74].mxu0 }
 0x1b2   :  { %v2251_v3 = vpop.f32.mrb[75].mxu0  ;;  %v2330_v57 = vpop.f32.mrb[74].mxu1 }
 0x1b3   :  { %v1354_v60 = vadd.f32 %v2329_v59, %v1209_v23  ;;  %v2252_v10 = vadd.f32 %v2251_v3, %v2250_v41  ;;  %v2331_v11 = vpop.f32.mrb[75].mxu1 }
 0x1b4   :  { %v2332_v12 = vadd.f32 %v2331_v11, %v2330_v57 }
 0x1b5   :  { %1417 = vst [vmem:[#allocation8 + $0x90] sm:$0xff] %v1354_v60  ;;  %v1214_v4 = vadd.f32 %v2252_v10, %v3258_v0  ;;  %v2253_v13 = vpop.f32.mrb[76].mxu0 }
 0x1b6   :  { %v2254_v63 = vpop.f32.mrb[77].mxu0  ;;  %v2333_v1 = vpop.f32.mrb[76].mxu1 }
 0x1b7   :  { %v1359_v2 = vadd.f32 %v2332_v12, %v1214_v4  ;;  %v2255_v5 = vadd.f32 %v2254_v63, %v2253_v13  ;;  %v2334_v6 = vpop.f32.mrb[77].mxu1 }
 0x1b8   :  { %v2335_v8 = vadd.f32 %v2334_v6, %v2333_v1 }
 0x1b9   :  { %1418 = vst [vmem:[#allocation8 + $0xb0] sm:$0xff] %v1359_v2  ;;  %v1219_v20 = vadd.f32 %v2255_v5, %v3258_v0  ;;  %v2256_v51 = vpop.f32.mrb[78].mxu0 }
 0x1ba   :  { %v2257_v36 = vpop.f32.mrb[79].mxu0  ;;  %v2336_v55 = vpop.f32.mrb[78].mxu1 }
 0x1bb   :  { %v1364_v18 = vadd.f32 %v2335_v8, %v1219_v20  ;;  %v2258_v37 = vadd.f32 %v2257_v36, %v2256_v51  ;;  %v2337_v40 = vpop.f32.mrb[79].mxu1 }
 0x1bc   :  { %v2338_v47 = vadd.f32 %v2337_v40, %v2336_v55 }
 0x1bd   :  { %1419 = vst [vmem:[#allocation8 + $0xd0] sm:$0xff] %v1364_v18  ;;  %v1224_v7 = vadd.f32 %v2258_v37, %v3258_v0  ;;  %v2259_v25 = vpop.f32.mrb[80].mxu0 }
 0x1be   :  { %v2260_v9 = vpop.f32.mrb[81].mxu0  ;;  %v2339_v56 = vpop.f32.mrb[80].mxu1 }
 0x1bf   :  { %v1369_v44 = vadd.f32 %v2338_v47, %v1224_v7  ;;  %v2261_v62 = vadd.f32 %v2260_v9, %v2259_v25  ;;  %v2340_v15 = vpop.f32.mrb[81].mxu1 }
 0x1c0   :  { %v2341_v16 = vadd.f32 %v2340_v15, %v2339_v56 }
 0x1c1   :  { %1420 = vst [vmem:[#allocation8 + $0xf0] sm:$0xff] %v1369_v44  ;;  %v1229_v35 = vadd.f32 %v2261_v62, %v3258_v0  ;;  %v2262_v17 = vpop.f32.mrb[82].mxu0 }
 0x1c2   :  { %v2263_v28 = vpop.f32.mrb[83].mxu0  ;;  %v2342_v19 = vpop.f32.mrb[82].mxu1 }
 0x1c3   :  { %v1374_v22 = vadd.f32 %v2341_v16, %v1229_v35  ;;  %v2264_v46 = vadd.f32 %v2263_v28, %v2262_v17  ;;  %v2343_v21 = vpop.f32.mrb[83].mxu1 }
 0x1c4   :  { %v2344_v24 = vadd.f32 %v2343_v21, %v2342_v19 }
 0x1c5   :  { %1421 = vst [vmem:[#allocation8 + $0x110] sm:$0xff] %v1374_v22  ;;  %v1234_v27 = vadd.f32 %v2264_v46, %v3258_v0  ;;  %v2265_v29 = vpop.f32.mrb[84].mxu0 }
 0x1c6   :  { %v2266_v31 = vpop.f32.mrb[85].mxu0  ;;  %v2345_v30 = vpop.f32.mrb[84].mxu1 }
 0x1c7   :  { %v1379_v14 = vadd.f32 %v2344_v24, %v1234_v27  ;;  %v2267_v32 = vadd.f32 %v2266_v31, %v2265_v29  ;;  %v2346_v26 = vpop.f32.mrb[85].mxu1 }
 0x1c8   :  { %v2347_v34 = vadd.f32 %v2346_v26, %v2345_v30 }
 0x1c9   :  { %1422 = vst [vmem:[#allocation8 + $0x130] sm:$0xff] %v1379_v14  ;;  %v1239_v38 = vadd.f32 %v2267_v32, %v3258_v0  ;;  %v2268_v33 = vpop.f32.mrb[86].mxu0 }
 0x1ca   :  { %v2269_v52 = vpop.f32.mrb[87].mxu0  ;;  %v2348_v39 = vpop.f32.mrb[86].mxu1 }
 0x1cb   :  { %v1384_v42 = vadd.f32 %v2347_v34, %v1239_v38  ;;  %v2270_v43 = vadd.f32 %v2269_v52, %v2268_v33  ;;  %v2349_v45 = vpop.f32.mrb[87].mxu1 }
 0x1cc   :  { %v2350_v48 = vadd.f32 %v2349_v45, %v2348_v39 }
 0x1cd   :  { %1423 = vst [vmem:[#allocation8 + $0x150] sm:$0xff] %v1384_v42  ;;  %v1244_v49 = vadd.f32 %v2270_v43, %v3258_v0  ;;  %v2271_v53 = vpop.f32.mrb[88].mxu0 }
 0x1ce   :  { %v2272_v61 = vpop.f32.mrb[89].mxu0  ;;  %v2351_v54 = vpop.f32.mrb[88].mxu1 }
 0x1cf   :  { %v1389_v50 = vadd.f32 %v2350_v48, %v1244_v49  ;;  %v2273_v58 = vadd.f32 %v2272_v61, %v2271_v53  ;;  %v2352_v59 = vpop.f32.mrb[89].mxu1  ;;  %v3346_v53 = vld [vmem:[%s3375_s2] ss:$0 sm:$0xff]  ;;  %s2873_s2 = smov [#allocation8]  }
 0x1d0   :  { %v2353_v23 = vadd.f32 %v2352_v59, %v2351_v54  ;;  %s1869_s13 = sshll.u32 %s2873_s2, 4  ;;  %s1870_s13 = int_to_ptr.vmem [resolvable:$true] %s1869_s13 }
 0x1d1   :  { %1424 = vst [vmem:[#allocation8 + $0x170] sm:$0xff] %v1389_v50  ;;  %v1249_v41 = vadd.f32 %v2273_v58, %v3258_v0  ;;  %v2274_v3 = vpop.f32.mrb[90].mxu0  ;;  %s2840_s14 = scalar_lea.vmem %s1870_s13, 8192  ;;  %p2845_p3 = scmp.lt.s32.totalorder %s1870_s13, %s1870_s13 }
 0x1d2   :  { %v2275_v57 = vpop.f32.mrb[91].mxu0  ;;  %v2354_v60 = vpop.f32.mrb[90].mxu1  ;;  %p2841_p2 = scmp.ne.s32.totalorder %s1870_s13, %s2840_s14  ;;  %p2846_p4 = scmp.lt.s32.totalorder %s2840_s14, %s2840_s14 }
 0x1d3   :  { %v1394_v10 = vadd.f32 %v2353_v23, %v1249_v41  ;;  %v2276_v11 = vadd.f32 %v2275_v57, %v2274_v3  ;;  %v2355_v12 = vpop.f32.mrb[91].mxu1 }
 0x1d4   :  { %v2356_v4 = vadd.f32 %v2355_v12, %v2354_v60  ;;  %p2847_p5 = por %p2846_p4, %p2845_p3 }
 0x1d5   :  { %1425 = vst [vmem:[#allocation8 + $0x190] sm:$0xff] %v1394_v10  ;;  %v1254_v13 = vadd.f32 %v2276_v11, %v3258_v0  ;;  %v2277_v63 = vpop.f32.mrb[92].mxu0 }
 0x1d6   :  { %v2278_v1 = vpop.f32.mrb[93].mxu0  ;;  %v2357_v2 = vpop.f32.mrb[92].mxu1  ;;  %p2848_p6 = pnand %p2847_p5, %p2841_p2 }
 0x1d7   :  { %v1399_v5 = vadd.f32 %v2356_v4, %v1254_v13  ;;  %v2279_v6 = vadd.f32 %v2278_v1, %v2277_v63  ;;  %v2358_v8 = vpop.f32.mrb[93].mxu1 }
 0x1d8   :  { %v2359_v20 = vadd.f32 %v2358_v8, %v2357_v2 }
 0x1d9   :  { %1426 = vst [vmem:[#allocation8 + $0x1b0] sm:$0xff] %v1399_v5  ;;  %v1259_v51 = vadd.f32 %v2279_v6, %v3258_v0  ;;  %v2280_v36 = vpop.f32.mrb[94].mxu0 }
 0x1da   :  { %v2281_v55 = vpop.f32.mrb[95].mxu0  ;;  %v2360_v18 = vpop.f32.mrb[94].mxu1 }
 0x1db   :  { %v1404_v37 = vadd.f32 %v2359_v20, %v1259_v51  ;;  %v2282_v40 = vadd.f32 %v2281_v55, %v2280_v36  ;;  %v2361_v47 = vpop.f32.mrb[95].mxu1 }
 0x1dc   :  { %v2362_v7 = vadd.f32 %v2361_v47, %v2360_v18 }
 0x1dd   :  { %1427 = vst [vmem:[#allocation8 + $0x1d0] sm:$0xff] %v1404_v37  ;;  %v1264_v25 = vadd.f32 %v2282_v40, %v3258_v0  ;;  %v2395_v9 = vpop.f32.mrb[96].mxu0 }
 0x1de   :  { %v2396_v56 = vpop.f32.mrb[97].mxu0  ;;  %v2475_v44 = vpop.f32.mrb[96].mxu1 }
 0x1df   :  { %v1409_v62 = vadd.f32 %v2362_v7, %v1264_v25  ;;  %v2397_v15 = vadd.f32 %v2396_v56, %v2395_v9  ;;  %v2476_v16 = vpop.f32.mrb[97].mxu1 }
 0x1e0   :  { %v2477_v35 = vadd.f32 %v2476_v16, %v2475_v44 }
 0x1e1   :  { %1428 = vst [vmem:[#allocation8 + $0x1f0] sm:$0xff] %v1409_v62  ;;  %v1625_v17 = vadd.f32 %v2397_v15, %v3258_v0  ;;  %v2398_v28 = vpop.f32.mrb[98].mxu0 }
 0x1e2   :  { %v2399_v19 = vpop.f32.mrb[99].mxu0  ;;  %v2478_v22 = vpop.f32.mrb[98].mxu1 }
 0x1e3   :  { %v1770_v46 = vadd.f32 %v2477_v35, %v1625_v17  ;;  %v2400_v21 = vadd.f32 %v2399_v19, %v2398_v28  ;;  %v2479_v24 = vpop.f32.mrb[99].mxu1 }
 0x1e4   :  { %v2480_v27 = vadd.f32 %v2479_v24, %v2478_v22 }
 0x1e5   :  { %1848 = vst [vmem:[#allocation8 + $0x18] sm:$0xff] %v1770_v46  ;;  %v1630_v29 = vadd.f32 %v2400_v21, %v3258_v0  ;;  %v2401_v31 = vpop.f32.mrb[100].mxu0 }
 0x1e6   :  { %v2402_v30 = vpop.f32.mrb[101].mxu0  ;;  %v2481_v14 = vpop.f32.mrb[100].mxu1 }
 0x1e7   :  { %v1775_v32 = vadd.f32 %v2480_v27, %v1630_v29  ;;  %v2403_v26 = vadd.f32 %v2402_v30, %v2401_v31  ;;  %v2482_v34 = vpop.f32.mrb[101].mxu1 }
 0x1e8   :  { %v2483_v38 = vadd.f32 %v2482_v34, %v2481_v14 }
 0x1e9   :  { %1849 = vst [vmem:[#allocation8 + $0x38] sm:$0xff] %v1775_v32  ;;  %v1635_v33 = vadd.f32 %v2403_v26, %v3258_v0  ;;  %v2404_v52 = vpop.f32.mrb[102].mxu0 }
 0x1ea   :  { %v2405_v39 = vpop.f32.mrb[103].mxu0  ;;  %v2484_v42 = vpop.f32.mrb[102].mxu1 }
 0x1eb   :  { %v1780_v43 = vadd.f32 %v2483_v38, %v1635_v33  ;;  %v2406_v45 = vadd.f32 %v2405_v39, %v2404_v52  ;;  %v2485_v48 = vpop.f32.mrb[103].mxu1 }
 0x1ec   :  { %v2486_v49 = vadd.f32 %v2485_v48, %v2484_v42 }
 0x1ed   :  { %1850 = vst [vmem:[#allocation8 + $0x58] sm:$0xff] %v1780_v43  ;;  %v1640_v61 = vadd.f32 %v3346_v53, %v2406_v45  ;;  %v2407_v54 = vpop.f32.mrb[104].mxu0 }
 0x1ee   :  { %v2408_v50 = vpop.f32.mrb[105].mxu0  ;;  %v2487_v58 = vpop.f32.mrb[104].mxu1 }
 0x1ef   :  { %v1785_v59 = vadd.f32 %v2486_v49, %v1640_v61  ;;  %v2409_v0 = vadd.f32 %v2408_v50, %v2407_v54  ;;  %v2488_v23 = vpop.f32.mrb[105].mxu1 }
 0x1f0   :  { %v2489_v41 = vadd.f32 %v2488_v23, %v2487_v58 }
 0x1f1   :  { %1851 = vst [vmem:[#allocation8 + $0x78] sm:$0xff] %v1785_v59  ;;  %v1645_v3 = vadd.f32 %v3346_v53, %v2409_v0  ;;  %v2410_v57 = vpop.f32.mrb[106].mxu0 }
 0x1f2   :  { %v2411_v60 = vpop.f32.mrb[107].mxu0  ;;  %v2490_v10 = vpop.f32.mrb[106].mxu1 }
 0x1f3   :  { %v1790_v11 = vadd.f32 %v2489_v41, %v1645_v3  ;;  %v2412_v12 = vadd.f32 %v2411_v60, %v2410_v57  ;;  %v2491_v4 = vpop.f32.mrb[107].mxu1 }
 0x1f4   :  { %v2492_v13 = vadd.f32 %v2491_v4, %v2490_v10 }
 0x1f5   :  { %1852 = vst [vmem:[#allocation8 + $0x98] sm:$0xff] %v1790_v11  ;;  %v1650_v63 = vadd.f32 %v3346_v53, %v2412_v12  ;;  %v2413_v1 = vpop.f32.mrb[108].mxu0 }
 0x1f6   :  { %v2414_v2 = vpop.f32.mrb[109].mxu0  ;;  %v2493_v5 = vpop.f32.mrb[108].mxu1 }
 0x1f7   :  { %v1795_v6 = vadd.f32 %v2492_v13, %v1650_v63  ;;  %v2415_v8 = vadd.f32 %v2414_v2, %v2413_v1  ;;  %v2494_v20 = vpop.f32.mrb[109].mxu1 }
 0x1f8   :  { %v2495_v51 = vadd.f32 %v2494_v20, %v2493_v5 }
 0x1f9   :  { %1853 = vst [vmem:[#allocation8 + $0xb8] sm:$0xff] %v1795_v6  ;;  %v1655_v36 = vadd.f32 %v3346_v53, %v2415_v8  ;;  %v2416_v55 = vpop.f32.mrb[110].mxu0 }
 0x1fa   :  { %v2417_v18 = vpop.f32.mrb[111].mxu0  ;;  %v2496_v37 = vpop.f32.mrb[110].mxu1 }
 0x1fb   :  { %v1800_v40 = vadd.f32 %v2495_v51, %v1655_v36  ;;  %v2418_v47 = vadd.f32 %v2417_v18, %v2416_v55  ;;  %v2497_v7 = vpop.f32.mrb[111].mxu1 }
 0x1fc   :  { %v2498_v25 = vadd.f32 %v2497_v7, %v2496_v37 }
 0x1fd   :  { %1854 = vst [vmem:[#allocation8 + $0xd8] sm:$0xff] %v1800_v40  ;;  %v1660_v9 = vadd.f32 %v3346_v53, %v2418_v47  ;;  %v2419_v56 = vpop.f32.mrb[112].mxu0 }
 0x1fe   :  { %v2420_v44 = vpop.f32.mrb[113].mxu0  ;;  %v2499_v62 = vpop.f32.mrb[112].mxu1 }
 0x1ff   :  { %v1805_v15 = vadd.f32 %v2498_v25, %v1660_v9  ;;  %v2421_v16 = vadd.f32 %v2420_v44, %v2419_v56  ;;  %v2500_v35 = vpop.f32.mrb[113].mxu1 }
 0x200   :  { %v2501_v17 = vadd.f32 %v2500_v35, %v2499_v62 }
 0x201   :  { %1855 = vst [vmem:[#allocation8 + $0xf8] sm:$0xff] %v1805_v15  ;;  %v1665_v28 = vadd.f32 %v3346_v53, %v2421_v16  ;;  %v2422_v19 = vpop.f32.mrb[114].mxu0 }
 0x202   :  { %v2423_v22 = vpop.f32.mrb[115].mxu0  ;;  %v2502_v46 = vpop.f32.mrb[114].mxu1 }
 0x203   :  { %v1810_v21 = vadd.f32 %v2501_v17, %v1665_v28  ;;  %v2424_v24 = vadd.f32 %v2423_v22, %v2422_v19  ;;  %v2503_v27 = vpop.f32.mrb[115].mxu1 }
 0x204   :  { %v2504_v29 = vadd.f32 %v2503_v27, %v2502_v46 }
 0x205   :  { %1856 = vst [vmem:[#allocation8 + $0x118] sm:$0xff] %v1810_v21  ;;  %v1670_v31 = vadd.f32 %v3346_v53, %v2424_v24  ;;  %v2425_v30 = vpop.f32.mrb[116].mxu0 }
 0x206   :  { %v2426_v14 = vpop.f32.mrb[117].mxu0  ;;  %v2505_v32 = vpop.f32.mrb[116].mxu1 }
 0x207   :  { %v1815_v26 = vadd.f32 %v2504_v29, %v1670_v31  ;;  %v2427_v34 = vadd.f32 %v2426_v14, %v2425_v30  ;;  %v2506_v38 = vpop.f32.mrb[117].mxu1 }
 0x208   :  { %v2507_v33 = vadd.f32 %v2506_v38, %v2505_v32 }
 0x209   :  { %1857 = vst [vmem:[#allocation8 + $0x138] sm:$0xff] %v1815_v26  ;;  %v1675_v52 = vadd.f32 %v3346_v53, %v2427_v34  ;;  %v2428_v39 = vpop.f32.mrb[118].mxu0 }
 0x20a   :  { %v2429_v42 = vpop.f32.mrb[119].mxu0  ;;  %v2508_v43 = vpop.f32.mrb[118].mxu1 }
 0x20b   :  { %v1820_v45 = vadd.f32 %v2507_v33, %v1675_v52  ;;  %v2430_v48 = vadd.f32 %v2429_v42, %v2428_v39  ;;  %v2509_v49 = vpop.f32.mrb[119].mxu1 }
 0x20c   :  { %v2510_v61 = vadd.f32 %v2509_v49, %v2508_v43 }
 0x20d   :  { %1858 = vst [vmem:[#allocation8 + $0x158] sm:$0xff] %v1820_v45  ;;  %v1680_v54 = vadd.f32 %v3346_v53, %v2430_v48  ;;  %v2431_v50 = vpop.f32.mrb[120].mxu0 }
 0x20e   :  { %v2432_v58 = vpop.f32.mrb[121].mxu0  ;;  %v2511_v59 = vpop.f32.mrb[120].mxu1 }
 0x20f   :  { %v1825_v0 = vadd.f32 %v2510_v61, %v1680_v54  ;;  %v2433_v23 = vadd.f32 %v2432_v58, %v2431_v50  ;;  %v2512_v41 = vpop.f32.mrb[121].mxu1 }
 0x210   :  { %v2513_v3 = vadd.f32 %v2512_v41, %v2511_v59 }
 0x211   :  { %1859 = vst [vmem:[#allocation8 + $0x178] sm:$0xff] %v1825_v0  ;;  %v1685_v57 = vadd.f32 %v3346_v53, %v2433_v23  ;;  %v2434_v60 = vpop.f32.mrb[122].mxu0 }
 0x212   :  { %v2435_v10 = vpop.f32.mrb[123].mxu0  ;;  %v2514_v11 = vpop.f32.mrb[122].mxu1 }
 0x213   :  { %v1830_v12 = vadd.f32 %v2513_v3, %v1685_v57  ;;  %v2436_v4 = vadd.f32 %v2435_v10, %v2434_v60  ;;  %v2515_v13 = vpop.f32.mrb[123].mxu1 }
 0x214   :  { %v2516_v63 = vadd.f32 %v2515_v13, %v2514_v11 }
 0x215   :  { %1860 = vst [vmem:[#allocation8 + $0x198] sm:$0xff] %v1830_v12  ;;  %v1690_v1 = vadd.f32 %v3346_v53, %v2436_v4  ;;  %v2437_v2 = vpop.f32.mrb[124].mxu0 }
 0x216   :  { %v2438_v5 = vpop.f32.mrb[125].mxu0  ;;  %v2517_v6 = vpop.f32.mrb[124].mxu1 }
 0x217   :  { %v1835_v8 = vadd.f32 %v2516_v63, %v1690_v1  ;;  %v2439_v20 = vadd.f32 %v2438_v5, %v2437_v2  ;;  %v2518_v51 = vpop.f32.mrb[125].mxu1 }
 0x218   :  { %v2519_v36 = vadd.f32 %v2518_v51, %v2517_v6 }
 0x219   :  { %1861 = vst [vmem:[#allocation8 + $0x1b8] sm:$0xff] %v1835_v8  ;;  %v1695_v55 = vadd.f32 %v3346_v53, %v2439_v20  ;;  %v2440_v18 = vpop.f32.mrb[126].mxu0 }
 0x21a   :  { %v2441_v37 = vpop.f32.mrb[127].mxu0  ;;  %v2520_v40 = vpop.f32.mrb[126].mxu1 }
 0x21b   :  { %v1840_v47 = vadd.f32 %v2519_v36, %v1695_v55  ;;  %v2442_v7 = vadd.f32 %v2441_v37, %v2440_v18  ;;  %v2521_v25 = vpop.f32.mrb[127].mxu1 }
 0x21c   :  { %v2522_v9 = vadd.f32 %v2521_v25, %v2520_v40 }
 0x21d   :  { %1862 = vst [vmem:[#allocation8 + $0x1d8] sm:$0xff] %v1840_v47  ;;  %v1700_v56 = vadd.f32 %v3346_v53, %v2442_v7 }
 0x21f   :  { %v1845_v44 = vadd.f32 %v2522_v9, %v1700_v56 }
 0x221   :  { %1863 = vst [vmem:[#allocation8 + $0x1f8] sm:$0xff] %v1845_v44 }
 0x222   :  { %2851 = shalt.err (!%p2848_p6)
}
 0x223   :  { %s2852_s17 = scalar_lea.hbm %s3376_s3, 8192 }
 0x224   :  { %p2853_p7 = scmp.ne.s32.totalorder %s3376_s3, %s2852_s17  ;;  %p2856_p8 = scmp.lt.u32.totalorder %s2852_s17, %s3376_s3 }
 0x226   :  { %p2858_p9 = pnand %p2856_p8, %p2853_p7 }
 0x228   :  { %2861 = shalt.err (!%p2858_p9)
}
 0x229   :  { %s2874_s22 = smov 256   ;;  %s2875_s23 = smov 16  }
 0x22a   :  { %1875 = dma.vmem_to_hbm [thread:$0]  %s1870_s13, 8192, %s3376_s3, [#allocation5], %s2874_s22, %s2874_s22, %s2875_s23  }
 0x22b   :  { %2866 = dma.done.wait [#allocation5], 8192  }
 0x22c   :  { %2867 = vsyncadd [#allocation5], 4294959104 }
 0x22d   :  { %1879 = vsyncpa [#allocation4], 1 }
 0x22e   :  { %1880 = vsyncpa [#allocation7], 1 }
 0x22f   :  { %1881 = vsyncpa [#allocation5], 1 }

</bundles_post_ra>
